<compile_context>
chip_gen: v5e
topology: v5e:2x2
jax: 0.10.0
libtpu: 0.0.40
codegen_flags: <defaults>
</compile_context>

<pallas_src>
import jax
import jax.numpy as jnp
from jax import lax
from jax.experimental import pallas as pl
from jax.experimental.pallas import tpu as pltpu

LANE = 128


def _round_up(n, m):
    return ((n + m - 1) // m) * m


# --------------------------------------------------------------------------
# Fused kernel: trunk (all TemporalBlocks) + consensus mean + output Linear
# --------------------------------------------------------------------------
def _make_fused_tcn_kernel(block_cfgs, *, K, T, Bblk):
    rows = Bblk * T

    def kernel(lens_ref, x_ref, w_ref, b_ref, w_out_ref, b_out_ref, o_ref):
        g = pl.program_id(0)

        row_i = lax.broadcasted_iota(jnp.int32, (rows, 1), 0)
        t_loc = row_i % T                        # time index within each sample

        def tap(a, s):
            # a[r] -> a[r - s] within each length-T sample, zero-filled.
            # Returned in bf16 (the MXU operand dtype) so taps stay small.
            # NOTE: the s >= T early-out is what makes the roll wrap-around
            # across the stacked-sample boundary fully masked — keep it.
            if s >= T:
                return jnp.zeros(a.shape, jnp.bfloat16)
            if s == 0:
                return a.astype(jnp.bfloat16)
            rolled = pltpu.roll(a, shift=s, axis=0)          # XLU, free-ish
            return jnp.where(t_loc >= s, rolled, 0.0).astype(jnp.bfloat16)

        def dilated_causal_conv(a, w_off, ncols, b_row, d, cin_p):
            # Dilated causal conv as a few MXU-depth-matched matmuls: taps are
            # grouped so each contraction chunk is <= 256 deep, and the full
            # (rows, K*C) im2col slab is never materialized.
            group = max(1, 256 // cin_p)
            acc = None
            k = 0
            while k < K:
                ks = list(range(k, min(k + group, K)))
                taps = [tap(a, (K - 1 - kk) * d) for kk in ks]
                chunk = taps[0] if len(taps) == 1 else jnp.concatenate(taps, axis=-1)
                r0 = w_off + ks[0] * cin_p                   # static offset
                w_chunk = w_ref[r0:r0 + len(ks) * cin_p, 0:ncols]
                p = jnp.dot(chunk, w_chunk, preferred_element_type=jnp.float32)
                acc = p if acc is None else acc + p
                k += group
            return acc + b_ref[b_row:b_row + 1, 0:ncols]

        # ---- trunk: activation stays resident in vregs across all blocks ----
        h = x_ref[...].astype(jnp.float32)                   # (rows, C_pad)
        for cfg in block_cfgs:
            d, cin_p, cout_p = cfg["dilation"], cfg["cin_p"], cfg["cout_p"]
            if cfg["has_downsample"]:
                # 1x1 downsample fused into conv1's extra output columns
                # (N = 2*C fills the 256-wide MXU; one matmul fewer).
                c1 = dilated_causal_conv(h, cfg["w1_off"], 2 * cout_p,
                                         cfg["b1_row"], d, cin_p)
                h1 = jnp.maximum(c1[:, :cout_p], 0.0)
                res = c1[:, cout_p:2 * cout_p]
            else:
                c1 = dilated_causal_conv(h, cfg["w1_off"], cout_p,
                                         cfg["b1_row"], d, cin_p)
                h1 = jnp.maximum(c1, 0.0)
                res = h
            h2 = dilated_causal_conv(h1, cfg["w2_off"], cout_p,
                                     cfg["b2_row"], d, cout_p)
            h = jnp.maximum(jnp.maximum(h2, 0.0) + res, 0.0)

        # ---- consensus: length mask + 1/L folded into the pooling matmul ----
        sel_r = lax.broadcasted_iota(jnp.int32, (Bblk, rows), 0)
        sel_c = lax.broadcasted_iota(jnp.int32, (Bblk, rows), 1)
        t_in = sel_c - sel_r * T
        in_samp = (t_in >= 0) & (t_in < T)
        L_mat = jnp.ones((Bblk, rows), jnp.int32)
        for b in range(Bblk):
            L_b = lens_ref[g * Bblk + b]                      # SMEM scalar
            L_mat = jnp.where(sel_r == b, L_b, L_mat)
        valid = in_samp & (t_in < L_mat)
        pool = jnp.where(valid,
                         1.0 / jnp.maximum(L_mat.astype(jnp.float32), 1.0), 0.0)
        means = jnp.dot(pool, h, preferred_element_type=jnp.float32)  # (Bblk, C)

        # ---- output Linear (tiny; kept f32 for accuracy) ----
        out = jnp.dot(means, w_out_ref[...],
                      preferred_element_type=jnp.float32) + b_out_ref[...]
        o_ref[0] = out

    return kernel


def _choose_batch_block(B, T, max_rows=128):
    """Largest divisor of B with Bblk*T <= max_rows (keeps vreg pressure /
    spill traffic down), preferring G = B/Bblk >= 2 so v7x's two TensorCores
    both get work, and satisfying the (8, 128) block-shape rule."""
    valid = [c for c in range(1, B + 1)
             if B % c == 0 and (c == B or (c * T) % 8 == 0)]
    fit = [c for c in valid if c * T <= max_rows]
    multi = [c for c in fit if B // c >= 2]
    if multi:
        return max(multi)
    if fit:
        return max(fit)
    return min(valid)


def tcn_forward(x, lengths, kparams):
    """Fused TCN forward: trunk + consensus + output linear in one pallas_call."""
    B, T, Cin = x.shape
    K = kparams["kernel_size"]
    cfgs = kparams["block_cfgs"]
    w_slab, b_slab = kparams["weights"], kparams["biases"]
    w_out, b_out = kparams["w_out"], kparams["b_out"]
    cin_p = kparams["cin_pad"]
    nc_p = w_out.shape[-1]

    Bblk = _choose_batch_block(B, T)
    G = B // Bblk
    rows = Bblk * T

    # lane-pad input channels once; flatten time onto sublanes; stream in bf16
    xp = jnp.pad(x, ((0, 0), (0, 0), (0, cin_p - Cin)))
    xp = xp.reshape(B * T, cin_p).astype(jnp.bfloat16)
    lengths = lengths.astype(jnp.int32)

    kernel = _make_fused_tcn_kernel(cfgs, K=K, T=T, Bblk=Bblk)

    def _resident(a):      # full-array block, constant index -> stays in VMEM
        return pl.BlockSpec(a.shape, lambda g, lens: (0,) * a.ndim)

    in_specs = [pl.BlockSpec((rows, cin_p), lambda g, lens: (g, 0)),
                _resident(w_slab), _resident(b_slab),
                _resident(w_out), _resident(b_out)]

    # VMEM budget: resident params + pipeline buffers + spill headroom,
    # capped at v7x's 64 MiB per-core VMEM.
    def nbytes(a):
        return a.size * a.dtype.itemsize
    resident = nbytes(w_slab) + nbytes(b_slab) + nbytes(w_out) + nbytes(b_out)
    streamed = rows * cin_p * 2 + Bblk * nc_p * 4
    vmem_limit = int(min(max(2 * (resident + streamed) + (8 << 20), 32 << 20),
                         64 << 20))

    out = pl.pallas_call(
        kernel,
        out_shape=jax.ShapeDtypeStruct((G, Bblk, nc_p), jnp.float32),
        grid_spec=pltpu.PrefetchScalarGridSpec(
            num_scalar_prefetch=1,            # lengths -> SMEM
            grid=(G,),
            in_specs=in_specs,
            out_specs=pl.BlockSpec((1, Bblk, nc_p), lambda g, lens: (g, 0, 0)),
        ),
        compiler_params=pltpu.CompilerParams(
            dimension_semantics=("parallel",),   # batch axis -> megacore
            vmem_limit_bytes=vmem_limit),
    )(lengths, xp, w_slab, b_slab, w_out, b_out)

    return out.reshape(B, nc_p)[:, :kparams["num_classes"]]


# --------------------------------------------------------------------------
# Parameter construction (logical, f32) and packing (padded, bf16 slabs)
# --------------------------------------------------------------------------
def make_params(key, input_size, num_channels, num_classes, kernel_size):
    params = {"blocks": []}
    cin = input_size
    for i, cout in enumerate(num_channels):
        keys = jax.random.split(jax.random.fold_in(key, i), 6)
        blk = {
            "w1": 0.05 * jax.random.normal(keys[0], (kernel_size, cin, cout), jnp.float32),
            "b1": 0.05 * jax.random.normal(keys[1], (1, cout), jnp.float32),
            "w2": 0.05 * jax.random.normal(keys[2], (kernel_size, cout, cout), jnp.float32),
            "b2": 0.05 * jax.random.normal(keys[3], (1, cout), jnp.float32),
            "dilation": 2 ** i,
            "has_downsample": cin != cout,
        }
        if blk["has_downsample"]:
            blk["wd"] = 0.05 * jax.random.normal(keys[4], (cin, cout), jnp.float32)
            blk["bd"] = 0.05 * jax.random.normal(keys[5], (1, cout), jnp.float32)
        params["blocks"].append(blk)
        cin = cout
    keys = jax.random.split(jax.random.fold_in(key, 999), 2)
    params["w_out"] = 0.05 * jax.random.normal(keys[0], (cin, num_classes), jnp.float32)
    params["b_out"] = 0.05 * jax.random.normal(keys[1], (1, num_classes), jnp.float32)
    return params


def pack_params(params, kernel_size):
    """Zero-pad channels/classes to 128 lanes, fuse the 1x1 downsample into
    conv1's extra output columns, flatten conv weights to im2col layout and
    concatenate everything into one bf16 weight slab + one f32 bias slab."""
    K = kernel_size
    blocks = params["blocks"]

    NP = 0                                    # common lane width of the slabs
    for blk in blocks:
        cout_p = _round_up(blk["w1"].shape[2], LANE)
        NP = max(NP, 2 * cout_p if blk["has_downsample"] else cout_p)

    w_segs, b_rows, cfgs = [], [], []
    w_off, b_row = 0, 0
    for blk in blocks:
        _, cin, cout = blk["w1"].shape
        cin_p, cout_p = _round_up(cin, LANE), _round_up(cout, LANE)
        dsample = blk["has_downsample"]

        # conv1 (+ fused 1x1 downsample columns), im2col (K*cin_p, NP) layout
        w1 = jnp.zeros((K, cin_p, NP), jnp.float32).at[:, :cin, :cout].set(blk["w1"])
        b1 = jnp.zeros((1, NP), jnp.float32).at[:, :cout].set(blk["b1"])
        if dsample:
            # downsample acts on the un-shifted input -> shift-0 tap (k = K-1)
            w1 = w1.at[K - 1, :cin, cout_p:cout_p + cout].set(blk["wd"])
            b1 = b1.at[:, cout_p:cout_p + cout].set(blk["bd"])
        w1 = w1.reshape(K * cin_p, NP)

        w2 = jnp.zeros((K, cout_p, NP), jnp.float32).at[:, :cout, :cout].set(blk["w2"])
        w2 = w2.reshape(K * cout_p, NP)
        b2 = jnp.zeros((1, NP), jnp.float32).at[:, :cout].set(blk["b2"])

        cfgs.append({"dilation": int(blk["dilation"]),
                     "has_downsample": bool(dsample),
                     "cin_p": cin_p, "cout_p": cout_p,
                     "w1_off": w_off, "w2_off": w_off + K * cin_p,
                     "b1_row": b_row, "b2_row": b_row + 1})
        w_segs += [w1, w2]
        b_rows += [b1, b2]
        w_off += K * (cin_p + cout_p)
        b_row += 2

    w_slab = jnp.concatenate(w_segs, axis=0).astype(jnp.bfloat16)
    b_slab = jnp.concatenate(b_rows, axis=0)                 # (2*nblocks, NP) f32

    c_last, nc = params["w_out"].shape
    c_last_p, nc_p = _round_up(c_last, LANE), _round_up(nc, LANE)
    w_out = jnp.zeros((c_last_p, nc_p), jnp.float32).at[:c_last, :nc].set(params["w_out"])
    b_out = jnp.zeros((1, nc_p), jnp.float32).at[:, :nc].set(params["b_out"])

    return {"weights": w_slab, "biases": b_slab, "block_cfgs": cfgs,
            "kernel_size": K, "cin_pad": _round_up(blocks[0]["w1"].shape[1], LANE),
            "num_classes": nc, "w_out": w_out, "b_out": b_out}


# --------------------------------------------------------------------------
# Pure-JAX f32 reference (correctness check only)
# --------------------------------------------------------------------------
def _ref_causal_conv(x, w, b, dilation):
    K, T = w.shape[0], x.shape[1]
    pad = (K - 1) * dilation
    xpad = jnp.pad(x, ((0, 0), (pad, 0), (0, 0)))
    out = jnp.broadcast_to(b, (x.shape[0], T, w.shape[-1]))
    for k in range(K):
        out = out + jnp.einsum("btc,cd->btd",
                               xpad[:, k * dilation:k * dilation + T], w[k])
    return out


def tcn_forward_ref(x, lengths, params):
    h = x
    for blk in params["blocks"]:
        h1 = jax.nn.relu(_ref_causal_conv(h, blk["w1"], blk["b1"], blk["dilation"]))
        h2 = jax.nn.relu(_ref_causal_conv(h1, blk["w2"], blk["b2"], blk["dilation"]))
        res = h
        if blk["has_downsample"]:
            res = jnp.einsum("btc,cd->btd", h, blk["wd"]) + blk["bd"]
        h = jax.nn.relu(h2 + res)
    T = h.shape[1]
    mask = jnp.arange(T)[None, :, None] < lengths[:, None, None]
    mean = jnp.sum(jnp.where(mask, h, 0.0), axis=1) / lengths[:, None].astype(jnp.float32)
    return mean @ params["w_out"] + params["b_out"][0]


if __name__ == "__main__":
    # TODO(synk): the original TemporalConvNet class body isn't in the snippet;
    # we implement the canonical TCN temporal block (eval mode, dropout = id).
    B, T = 2, 8
    input_size = 32
    num_channels = (48, 64)
    num_classes = 16
    kernel_size = 3

    key = jax.random.PRNGKey(0)
    kx, kp = jax.random.split(key)
    x = jax.random.normal(kx, (B, T, input_size), jnp.float32)
    lengths = jnp.array([8, 5], dtype=jnp.int32)

    params = make_params(kp, input_size, num_channels, num_classes, kernel_size)
    kparams = pack_params(params, kernel_size)

    out = jax.block_until_ready(tcn_forward(x, lengths, kparams))
    ref = jax.block_until_ready(tcn_forward_ref(x, lengths, params))

    assert out.shape == (B, num_classes)
    # bf16 MXU operands / bf16 streamed input (f32 accumulation) vs pure-f32 ref.
    err = jnp.max(jnp.abs(out - ref))
    assert jnp.allclose(out, ref, atol=5e-2, rtol=5e-2), f"max abs err = {err}"
    print("KERNEL_OK")
</pallas_src>

<mosaic_0001>
module attributes {stable_mosaic.version = 11 : i64} {
  func.func @kernel(%arg0: i32, %arg1: memref<2xi32, #tpu.memory_space<smem>>, %arg2: memref<8x128xbf16, #tpu.memory_space<vmem>>, %arg3: memref<1536x256xbf16, #tpu.memory_space<vmem>>, %arg4: memref<4x256xf32, #tpu.memory_space<vmem>>, %arg5: memref<128x128xf32, #tpu.memory_space<vmem>>, %arg6: memref<1x128xf32, #tpu.memory_space<vmem>>, %arg7: memref<1x1x128xf32, #tpu.memory_space<vmem>>) attributes {dimension_semantics = [#tpu.dimension_semantics<parallel>], iteration_bounds = array<i64: 2>, scalar_prefetch = 1 : i64, scratch_operands = 0 : i64, tpu.core_type = #tpu.core_type<tc>, window_params = [{transform_indices = @transform_0, window_bounds = array<i64: 8, 128>}, {pipeline_mode = #tpu.pipeline_mode<synchronous>, transform_indices = @transform_1, window_bounds = array<i64: 1536, 256>}, {pipeline_mode = #tpu.pipeline_mode<synchronous>, transform_indices = @transform_2, window_bounds = array<i64: 4, 256>}, {pipeline_mode = #tpu.pipeline_mode<synchronous>, transform_indices = @transform_3, window_bounds = array<i64: 128, 128>}, {pipeline_mode = #tpu.pipeline_mode<synchronous>, transform_indices = @transform_4, window_bounds = array<i64: 1, 128>}, {transform_indices = @transform_5, window_bounds = array<i64: 1, 1, 128>}]} {
    %0 = tpu.iota {dimensions = array<i32: 0>} : vector<8x1xi32>
    %c8_i32 = arith.constant 8 : i32
    %c0_i32 = arith.constant 0 : i32
    %1 = arith.cmpi eq, %c8_i32, %c0_i32 : i32
    %c1_i32 = arith.constant 1 : i32
    %2 = arith.select %1, %c1_i32, %c8_i32 : i32
    %3 = vector.broadcast %2 : i32 to vector<8x1xi32>
    %4 = arith.remsi %0, %3 : vector<8x1xi32>
    %c0_i32_0 = arith.constant 0 : i32
    %5 = vector.broadcast %c0_i32_0 : i32 to vector<8x1xi32>
    %6 = arith.cmpi ne, %4, %5 : vector<8x1xi32>
    %c0_i32_1 = arith.constant 0 : i32
    %7 = vector.broadcast %c0_i32_1 : i32 to vector<8x1xi32>
    %8 = arith.cmpi slt, %4, %7 : vector<8x1xi32>
    %c0_i32_2 = arith.constant 0 : i32
    %9 = arith.cmpi slt, %2, %c0_i32_2 : i32
    %10 = vector.broadcast %9 : i1 to vector<8x1xi1>
    %11 = vector.broadcast %10 : vector<8x1xi1> to vector<8x1xi1>
    %12 = arith.xori %8, %11 : vector<8x1xi1>
    %13 = arith.andi %12, %6 : vector<8x1xi1>
    %14 = vector.broadcast %2 : i32 to vector<8x1xi32>
    %15 = arith.addi %4, %14 : vector<8x1xi32>
    %16 = arith.select %13, %15, %4 : vector<8x1xi1>, vector<8x1xi32>
    %c0 = arith.constant 0 : index
    %c0_3 = arith.constant 0 : index
    %17 = vector.load %arg2[%c0, %c0_3] : memref<8x128xbf16, #tpu.memory_space<vmem>>, vector<8x128xbf16>
    %18 = arith.extf %17 : vector<8x128xbf16> to vector<8x128xf32>
    %c2_i32 = arith.constant 2 : i32
    %19 = tpu.dynamic_rotate %18 by %c2_i32 dim 0 : vector<8x128xf32>, i32 -> vector<8x128xf32>
    %c2_i32_4 = arith.constant 2 : i32
    %20 = vector.broadcast %c2_i32_4 : i32 to vector<8x1xi32>
    %21 = arith.cmpi sge, %16, %20 : vector<8x1xi32>
    %cst = arith.constant 0.000000e+00 : f32
    %22 = vector.shape_cast %21 : vector<8x1xi1> to vector<8x1xi1>
    %23 = vector.broadcast %22 : vector<8x1xi1> to vector<8x128xi1>
    %24 = vector.broadcast %cst : f32 to vector<8x128xf32>
    %25 = arith.select %23, %19, %24 : vector<8x128xi1>, vector<8x128xf32>
    %26 = arith.truncf %25 : vector<8x128xf32> to vector<8x128xbf16>
    %c1_i32_5 = arith.constant 1 : i32
    %27 = tpu.dynamic_rotate %18 by %c1_i32_5 dim 0 : vector<8x128xf32>, i32 -> vector<8x128xf32>
    %c1_i32_6 = arith.constant 1 : i32
    %28 = vector.broadcast %c1_i32_6 : i32 to vector<8x1xi32>
    %29 = arith.cmpi sge, %16, %28 : vector<8x1xi32>
    %cst_7 = arith.constant 0.000000e+00 : f32
    %30 = vector.shape_cast %29 : vector<8x1xi1> to vector<8x1xi1>
    %31 = vector.broadcast %30 : vector<8x1xi1> to vector<8x128xi1>
    %32 = vector.broadcast %cst_7 : f32 to vector<8x128xf32>
    %33 = arith.select %31, %27, %32 : vector<8x128xi1>, vector<8x128xf32>
    %34 = arith.truncf %33 : vector<8x128xf32> to vector<8x128xbf16>
    %35 = tpu.concatenate %26, %34 in 1 : vector<8x128xbf16>, vector<8x128xbf16> -> vector<8x256xbf16>
    %c0_8 = arith.constant 0 : index
    %c0_9 = arith.constant 0 : index
    %36 = vector.load %arg3[%c0_8, %c0_9] : memref<1536x256xbf16, #tpu.memory_space<vmem>>, vector<256x256xbf16>
    %cst_10 = arith.constant dense<0.000000e+00> : vector<8x256xf32>
    %37 = tpu.matmul %35, %36, %cst_10 {dimension_numbers = #tpu.dot_dimension_numbers<[1], [0], [0], [1], [0, 0, 1, 1], [], []>} : vector<8x256xbf16>, vector<256x256xbf16>, vector<8x256xf32> -> vector<8x256xf32>
    %38 = arith.truncf %18 : vector<8x128xf32> to vector<8x128xbf16>
    %c256 = arith.constant 256 : index
    %c0_11 = arith.constant 0 : index
    %39 = vector.load %arg3[%c256, %c0_11] : memref<1536x256xbf16, #tpu.memory_space<vmem>>, vector<128x256xbf16>
    %cst_12 = arith.constant dense<0.000000e+00> : vector<8x256xf32>
    %40 = tpu.matmul %38, %39, %cst_12 {dimension_numbers = #tpu.dot_dimension_numbers<[1], [0], [0], [1], [0, 0, 1, 1], [], []>} : vector<8x128xbf16>, vector<128x256xbf16>, vector<8x256xf32> -> vector<8x256xf32>
    %41 = arith.addf %37, %40 : vector<8x256xf32>
    %c0_13 = arith.constant 0 : index
    %c0_14 = arith.constant 0 : index
    %42 = vector.load %arg4[%c0_13, %c0_14] : memref<4x256xf32, #tpu.memory_space<vmem>>, vector<1x256xf32>
    %43 = vector.broadcast %42 : vector<1x256xf32> to vector<8x256xf32>
    %44 = arith.addf %41, %43 : vector<8x256xf32>
    %45 = vector.extract_strided_slice %44 {offsets = [0, 0], sizes = [8, 128], strides = [1, 1]} : vector<8x256xf32> to vector<8x128xf32>
    %cst_15 = arith.constant 0.000000e+00 : f32
    %46 = vector.broadcast %cst_15 : f32 to vector<8x128xf32>
    %47 = arith.maximumf %45, %46 : vector<8x128xf32>
    %48 = vector.extract_strided_slice %44 {offsets = [0, 128], sizes = [8, 128], strides = [1, 1]} : vector<8x256xf32> to vector<8x128xf32>
    %c2_i32_16 = arith.constant 2 : i32
    %49 = tpu.dynamic_rotate %47 by %c2_i32_16 dim 0 : vector<8x128xf32>, i32 -> vector<8x128xf32>
    %c2_i32_17 = arith.constant 2 : i32
    %50 = vector.broadcast %c2_i32_17 : i32 to vector<8x1xi32>
    %51 = arith.cmpi sge, %16, %50 : vector<8x1xi32>
    %cst_18 = arith.constant 0.000000e+00 : f32
    %52 = vector.shape_cast %51 : vector<8x1xi1> to vector<8x1xi1>
    %53 = vector.broadcast %52 : vector<8x1xi1> to vector<8x128xi1>
    %54 = vector.broadcast %cst_18 : f32 to vector<8x128xf32>
    %55 = arith.select %53, %49, %54 : vector<8x128xi1>, vector<8x128xf32>
    %56 = arith.truncf %55 : vector<8x128xf32> to vector<8x128xbf16>
    %c1_i32_19 = arith.constant 1 : i32
    %57 = tpu.dynamic_rotate %47 by %c1_i32_19 dim 0 : vector<8x128xf32>, i32 -> vector<8x128xf32>
    %c1_i32_20 = arith.constant 1 : i32
    %58 = vector.broadcast %c1_i32_20 : i32 to vector<8x1xi32>
    %59 = arith.cmpi sge, %16, %58 : vector<8x1xi32>
    %cst_21 = arith.constant 0.000000e+00 : f32
    %60 = vector.shape_cast %59 : vector<8x1xi1> to vector<8x1xi1>
    %61 = vector.broadcast %60 : vector<8x1xi1> to vector<8x128xi1>
    %62 = vector.broadcast %cst_21 : f32 to vector<8x128xf32>
    %63 = arith.select %61, %57, %62 : vector<8x128xi1>, vector<8x128xf32>
    %64 = arith.truncf %63 : vector<8x128xf32> to vector<8x128xbf16>
    %65 = tpu.concatenate %56, %64 in 1 : vector<8x128xbf16>, vector<8x128xbf16> -> vector<8x256xbf16>
    %c384 = arith.constant 384 : index
    %c0_22 = arith.constant 0 : index
    %66 = vector.load %arg3[%c384, %c0_22] : memref<1536x256xbf16, #tpu.memory_space<vmem>>, vector<256x128xbf16>
    %cst_23 = arith.constant dense<0.000000e+00> : vector<8x128xf32>
    %67 = tpu.matmul %65, %66, %cst_23 {dimension_numbers = #tpu.dot_dimension_numbers<[1], [0], [0], [1], [0, 0, 1, 1], [], []>} : vector<8x256xbf16>, vector<256x128xbf16>, vector<8x128xf32> -> vector<8x128xf32>
    %68 = arith.truncf %47 : vector<8x128xf32> to vector<8x128xbf16>
    %c640 = arith.constant 640 : index
    %c0_24 = arith.constant 0 : index
    %69 = vector.load %arg3[%c640, %c0_24] : memref<1536x256xbf16, #tpu.memory_space<vmem>>, vector<128x128xbf16>
    %cst_25 = arith.constant dense<0.000000e+00> : vector<8x128xf32>
    %70 = tpu.matmul %68, %69, %cst_25 {dimension_numbers = #tpu.dot_dimension_numbers<[1], [0], [0], [1], [0, 0, 1, 1], [], []>} : vector<8x128xbf16>, vector<128x128xbf16>, vector<8x128xf32> -> vector<8x128xf32>
    %71 = arith.addf %67, %70 : vector<8x128xf32>
    %c1 = arith.constant 1 : index
    %c0_26 = arith.constant 0 : index
    %72 = vector.load %arg4[%c1, %c0_26] : memref<4x256xf32, #tpu.memory_space<vmem>>, vector<1x128xf32>
    %73 = vector.broadcast %72 : vector<1x128xf32> to vector<8x128xf32>
    %74 = arith.addf %71, %73 : vector<8x128xf32>
    %cst_27 = arith.constant 0.000000e+00 : f32
    %75 = vector.broadcast %cst_27 : f32 to vector<8x128xf32>
    %76 = arith.maximumf %74, %75 : vector<8x128xf32>
    %77 = arith.addf %76, %48 : vector<8x128xf32>
    %cst_28 = arith.constant 0.000000e+00 : f32
    %78 = vector.broadcast %cst_28 : f32 to vector<8x128xf32>
    %79 = arith.maximumf %77, %78 : vector<8x128xf32>
    %c4_i32 = arith.constant 4 : i32
    %80 = tpu.dynamic_rotate %79 by %c4_i32 dim 0 : vector<8x128xf32>, i32 -> vector<8x128xf32>
    %c4_i32_29 = arith.constant 4 : i32
    %81 = vector.broadcast %c4_i32_29 : i32 to vector<8x1xi32>
    %82 = arith.cmpi sge, %16, %81 : vector<8x1xi32>
    %cst_30 = arith.constant 0.000000e+00 : f32
    %83 = vector.shape_cast %82 : vector<8x1xi1> to vector<8x1xi1>
    %84 = vector.broadcast %83 : vector<8x1xi1> to vector<8x128xi1>
    %85 = vector.broadcast %cst_30 : f32 to vector<8x128xf32>
    %86 = arith.select %84, %80, %85 : vector<8x128xi1>, vector<8x128xf32>
    %87 = arith.truncf %86 : vector<8x128xf32> to vector<8x128xbf16>
    %c2_i32_31 = arith.constant 2 : i32
    %88 = tpu.dynamic_rotate %79 by %c2_i32_31 dim 0 : vector<8x128xf32>, i32 -> vector<8x128xf32>
    %c2_i32_32 = arith.constant 2 : i32
    %89 = vector.broadcast %c2_i32_32 : i32 to vector<8x1xi32>
    %90 = arith.cmpi sge, %16, %89 : vector<8x1xi32>
    %cst_33 = arith.constant 0.000000e+00 : f32
    %91 = vector.shape_cast %90 : vector<8x1xi1> to vector<8x1xi1>
    %92 = vector.broadcast %91 : vector<8x1xi1> to vector<8x128xi1>
    %93 = vector.broadcast %cst_33 : f32 to vector<8x128xf32>
    %94 = arith.select %92, %88, %93 : vector<8x128xi1>, vector<8x128xf32>
    %95 = arith.truncf %94 : vector<8x128xf32> to vector<8x128xbf16>
    %96 = tpu.concatenate %87, %95 in 1 : vector<8x128xbf16>, vector<8x128xbf16> -> vector<8x256xbf16>
    %c768 = arith.constant 768 : index
    %c0_34 = arith.constant 0 : index
    %97 = vector.load %arg3[%c768, %c0_34] : memref<1536x256xbf16, #tpu.memory_space<vmem>>, vector<256x256xbf16>
    %cst_35 = arith.constant dense<0.000000e+00> : vector<8x256xf32>
    %98 = tpu.matmul %96, %97, %cst_35 {dimension_numbers = #tpu.dot_dimension_numbers<[1], [0], [0], [1], [0, 0, 1, 1], [], []>} : vector<8x256xbf16>, vector<256x256xbf16>, vector<8x256xf32> -> vector<8x256xf32>
    %99 = arith.truncf %79 : vector<8x128xf32> to vector<8x128xbf16>
    %c1024 = arith.constant 1024 : index
    %c0_36 = arith.constant 0 : index
    %100 = vector.load %arg3[%c1024, %c0_36] : memref<1536x256xbf16, #tpu.memory_space<vmem>>, vector<128x256xbf16>
    %cst_37 = arith.constant dense<0.000000e+00> : vector<8x256xf32>
    %101 = tpu.matmul %99, %100, %cst_37 {dimension_numbers = #tpu.dot_dimension_numbers<[1], [0], [0], [1], [0, 0, 1, 1], [], []>} : vector<8x128xbf16>, vector<128x256xbf16>, vector<8x256xf32> -> vector<8x256xf32>
    %102 = arith.addf %98, %101 : vector<8x256xf32>
    %c2 = arith.constant 2 : index
    %c0_38 = arith.constant 0 : index
    %103 = vector.load %arg4[%c2, %c0_38] : memref<4x256xf32, #tpu.memory_space<vmem>>, vector<1x256xf32>
    %104 = vector.broadcast %103 : vector<1x256xf32> to vector<8x256xf32>
    %105 = arith.addf %102, %104 : vector<8x256xf32>
    %106 = vector.extract_strided_slice %105 {offsets = [0, 0], sizes = [8, 128], strides = [1, 1]} : vector<8x256xf32> to vector<8x128xf32>
    %cst_39 = arith.constant 0.000000e+00 : f32
    %107 = vector.broadcast %cst_39 : f32 to vector<8x128xf32>
    %108 = arith.maximumf %106, %107 : vector<8x128xf32>
    %109 = vector.extract_strided_slice %105 {offsets = [0, 128], sizes = [8, 128], strides = [1, 1]} : vector<8x256xf32> to vector<8x128xf32>
    %c4_i32_40 = arith.constant 4 : i32
    %110 = tpu.dynamic_rotate %108 by %c4_i32_40 dim 0 : vector<8x128xf32>, i32 -> vector<8x128xf32>
    %c4_i32_41 = arith.constant 4 : i32
    %111 = vector.broadcast %c4_i32_41 : i32 to vector<8x1xi32>
    %112 = arith.cmpi sge, %16, %111 : vector<8x1xi32>
    %cst_42 = arith.constant 0.000000e+00 : f32
    %113 = vector.shape_cast %112 : vector<8x1xi1> to vector<8x1xi1>
    %114 = vector.broadcast %113 : vector<8x1xi1> to vector<8x128xi1>
    %115 = vector.broadcast %cst_42 : f32 to vector<8x128xf32>
    %116 = arith.select %114, %110, %115 : vector<8x128xi1>, vector<8x128xf32>
    %117 = arith.truncf %116 : vector<8x128xf32> to vector<8x128xbf16>
    %c2_i32_43 = arith.constant 2 : i32
    %118 = tpu.dynamic_rotate %108 by %c2_i32_43 dim 0 : vector<8x128xf32>, i32 -> vector<8x128xf32>
    %c2_i32_44 = arith.constant 2 : i32
    %119 = vector.broadcast %c2_i32_44 : i32 to vector<8x1xi32>
    %120 = arith.cmpi sge, %16, %119 : vector<8x1xi32>
    %cst_45 = arith.constant 0.000000e+00 : f32
    %121 = vector.shape_cast %120 : vector<8x1xi1> to vector<8x1xi1>
    %122 = vector.broadcast %121 : vector<8x1xi1> to vector<8x128xi1>
    %123 = vector.broadcast %cst_45 : f32 to vector<8x128xf32>
    %124 = arith.select %122, %118, %123 : vector<8x128xi1>, vector<8x128xf32>
    %125 = arith.truncf %124 : vector<8x128xf32> to vector<8x128xbf16>
    %126 = tpu.concatenate %117, %125 in 1 : vector<8x128xbf16>, vector<8x128xbf16> -> vector<8x256xbf16>
    %c1152 = arith.constant 1152 : index
    %c0_46 = arith.constant 0 : index
    %127 = vector.load %arg3[%c1152, %c0_46] : memref<1536x256xbf16, #tpu.memory_space<vmem>>, vector<256x128xbf16>
    %cst_47 = arith.constant dense<0.000000e+00> : vector<8x128xf32>
    %128 = tpu.matmul %126, %127, %cst_47 {dimension_numbers = #tpu.dot_dimension_numbers<[1], [0], [0], [1], [0, 0, 1, 1], [], []>} : vector<8x256xbf16>, vector<256x128xbf16>, vector<8x128xf32> -> vector<8x128xf32>
    %129 = arith.truncf %108 : vector<8x128xf32> to vector<8x128xbf16>
    %c1408 = arith.constant 1408 : index
    %c0_48 = arith.constant 0 : index
    %130 = vector.load %arg3[%c1408, %c0_48] : memref<1536x256xbf16, #tpu.memory_space<vmem>>, vector<128x128xbf16>
    %cst_49 = arith.constant dense<0.000000e+00> : vector<8x128xf32>
    %131 = tpu.matmul %129, %130, %cst_49 {dimension_numbers = #tpu.dot_dimension_numbers<[1], [0], [0], [1], [0, 0, 1, 1], [], []>} : vector<8x128xbf16>, vector<128x128xbf16>, vector<8x128xf32> -> vector<8x128xf32>
    %132 = arith.addf %128, %131 : vector<8x128xf32>
    %c3 = arith.constant 3 : index
    %c0_50 = arith.constant 0 : index
    %133 = vector.load %arg4[%c3, %c0_50] : memref<4x256xf32, #tpu.memory_space<vmem>>, vector<1x128xf32>
    %134 = vector.broadcast %133 : vector<1x128xf32> to vector<8x128xf32>
    %135 = arith.addf %132, %134 : vector<8x128xf32>
    %cst_51 = arith.constant 0.000000e+00 : f32
    %136 = vector.broadcast %cst_51 : f32 to vector<8x128xf32>
    %137 = arith.maximumf %135, %136 : vector<8x128xf32>
    %138 = arith.addf %137, %109 : vector<8x128xf32>
    %cst_52 = arith.constant 0.000000e+00 : f32
    %139 = vector.broadcast %cst_52 : f32 to vector<8x128xf32>
    %140 = arith.maximumf %138, %139 : vector<8x128xf32>
    %141 = tpu.iota {dimensions = array<i32: 0>} : vector<1x8xi32>
    %142 = tpu.iota {dimensions = array<i32: 1>} : vector<1x8xi32>
    %c8_i32_53 = arith.constant 8 : i32
    %143 = vector.broadcast %c8_i32_53 : i32 to vector<1x8xi32>
    %144 = arith.muli %141, %143 : vector<1x8xi32>
    %145 = arith.subi %142, %144 : vector<1x8xi32>
    %c0_i32_54 = arith.constant 0 : i32
    %146 = vector.broadcast %c0_i32_54 : i32 to vector<1x8xi32>
    %147 = arith.cmpi sge, %145, %146 : vector<1x8xi32>
    %c8_i32_55 = arith.constant 8 : i32
    %148 = vector.broadcast %c8_i32_55 : i32 to vector<1x8xi32>
    %149 = arith.cmpi slt, %145, %148 : vector<1x8xi32>
    %150 = arith.andi %147, %149 : vector<1x8xi1>
    %c1_i32_56 = arith.constant 1 : i32
    %151 = vector.broadcast %c1_i32_56 : i32 to vector<1x8xi32>
    %c1_i32_57 = arith.constant 1 : i32
    %152 = arith.muli %arg0, %c1_i32_57 : i32
    %c0_i32_58 = arith.constant 0 : i32
    %153 = arith.addi %152, %c0_i32_58 : i32
    %154 = arith.index_cast %153 : i32 to index
    %155 = memref.load %arg1[%154] : memref<2xi32, #tpu.memory_space<smem>>
    %c0_i32_59 = arith.constant 0 : i32
    %156 = vector.broadcast %c0_i32_59 : i32 to vector<1x8xi32>
    %157 = arith.cmpi eq, %141, %156 : vector<1x8xi32>
    %158 = vector.broadcast %155 : i32 to vector<1x8xi32>
    %159 = arith.select %157, %158, %151 : vector<1x8xi1>, vector<1x8xi32>
    %160 = arith.cmpi slt, %145, %159 : vector<1x8xi32>
    %161 = arith.andi %150, %160 : vector<1x8xi1>
    %162 = arith.sitofp %159 : vector<1x8xi32> to vector<1x8xf32>
    %cst_60 = arith.constant 1.000000e+00 : f32
    %163 = vector.broadcast %cst_60 : f32 to vector<1x8xf32>
    %164 = arith.maximumf %162, %163 : vector<1x8xf32>
    %cst_61 = arith.constant 1.000000e+00 : f32
    %165 = vector.broadcast %cst_61 : f32 to vector<1x8xf32>
    %166 = arith.divf %165, %164 : vector<1x8xf32>
    %cst_62 = arith.constant 0.000000e+00 : f32
    %167 = vector.broadcast %cst_62 : f32 to vector<1x8xf32>
    %168 = arith.select %161, %166, %167 : vector<1x8xi1>, vector<1x8xf32>
    %cst_63 = arith.constant dense<0.000000e+00> : vector<1x128xf32>
    %169 = tpu.matmul %168, %140, %cst_63 {dimension_numbers = #tpu.dot_dimension_numbers<[1], [0], [0], [1], [0, 0, 1, 1], [], []>} : vector<1x8xf32>, vector<8x128xf32>, vector<1x128xf32> -> vector<1x128xf32>
    %c0_64 = arith.constant 0 : index
    %c0_65 = arith.constant 0 : index
    %170 = vector.load %arg5[%c0_64, %c0_65] : memref<128x128xf32, #tpu.memory_space<vmem>>, vector<128x128xf32>
    %cst_66 = arith.constant dense<0.000000e+00> : vector<1x128xf32>
    %171 = tpu.matmul %169, %170, %cst_66 {dimension_numbers = #tpu.dot_dimension_numbers<[1], [0], [0], [1], [0, 0, 1, 1], [], []>} : vector<1x128xf32>, vector<128x128xf32>, vector<1x128xf32> -> vector<1x128xf32>
    %c0_67 = arith.constant 0 : index
    %c0_68 = arith.constant 0 : index
    %172 = vector.load %arg6[%c0_67, %c0_68] : memref<1x128xf32, #tpu.memory_space<vmem>>, vector<1x128xf32>
    %173 = arith.addf %171, %172 : vector<1x128xf32>
    %c0_69 = arith.constant 0 : index
    %c0_70 = arith.constant 0 : index
    %c0_71 = arith.constant 0 : index
    %174 = vector.load %arg7[%c0_69, %c0_70, %c0_71] : memref<1x1x128xf32, #tpu.memory_space<vmem>>, vector<1x1x128xf32>
    %175 = vector.shape_cast %174 : vector<1x1x128xf32> to vector<1x128xf32>
    %176 = vector.shape_cast %173 : vector<1x128xf32> to vector<1x1x128xf32>
    tpu.vector_store %arg7[%c0_69, %c0_70, %c0_71], %176 {strides = array<i32>} : memref<1x1x128xf32, #tpu.memory_space<vmem>>, vector<1x1x128xf32>,
    return
  }
  func.func @transform_0(%arg0: i32, %arg1: memref<2xi32, #tpu.memory_space<smem>>) -> (i32, i32) {
    %c0_i32 = arith.constant 0 : i32
    %c0_i32_0 = arith.constant 0 : i32
    return %arg0, %c0_i32 : i32, i32
  }
  func.func @transform_1(%arg0: i32, %arg1: memref<2xi32, #tpu.memory_space<smem>>) -> (i32, i32) {
    %c0_i32 = arith.constant 0 : i32
    %c0_i32_0 = arith.constant 0 : i32
    %c0_i32_1 = arith.constant 0 : i32
    return %c0_i32, %c0_i32_0 : i32, i32
  }
  func.func @transform_2(%arg0: i32, %arg1: memref<2xi32, #tpu.memory_space<smem>>) -> (i32, i32) {
    %c0_i32 = arith.constant 0 : i32
    %c0_i32_0 = arith.constant 0 : i32
    %c0_i32_1 = arith.constant 0 : i32
    return %c0_i32, %c0_i32_0 : i32, i32
  }
  func.func @transform_3(%arg0: i32, %arg1: memref<2xi32, #tpu.memory_space<smem>>) -> (i32, i32) {
    %c0_i32 = arith.constant 0 : i32
    %c0_i32_0 = arith.constant 0 : i32
    %c0_i32_1 = arith.constant 0 : i32
    return %c0_i32, %c0_i32_0 : i32, i32
  }
  func.func @transform_4(%arg0: i32, %arg1: memref<2xi32, #tpu.memory_space<smem>>) -> (i32, i32) {
    %c0_i32 = arith.constant 0 : i32
    %c0_i32_0 = arith.constant 0 : i32
    %c0_i32_1 = arith.constant 0 : i32
    return %c0_i32, %c0_i32_0 : i32, i32
  }
  func.func @transform_5(%arg0: i32, %arg1: memref<2xi32, #tpu.memory_space<smem>>) -> (i32, i32, i32) {
    %c0_i32 = arith.constant 0 : i32
    %c0_i32_0 = arith.constant 0 : i32
    %c0_i32_1 = arith.constant 0 : i32
    return %arg0, %c0_i32, %c0_i32_0 : i32, i32, i32
  }
}

</mosaic_0001>

<bundles_post_ra>
// kernel: tpu_custom_call.1
= control target key start
LH: loop header
LB: loop body
LE: loop exit
PB: predicated region body
PF: predicated region fallthrough
CT: control target
= control target key end

     0   :  { %s2842_s24 = smov [#allocation3]   ;;  %s3133_s0 = inlined_call_operand.hbm [shape: s32[2], index: 0, kind: input, shape index: {}]   ;;  %s3134_s1 = inlined_call_operand.hbm [shape: bf16[16,128], index: 1, kind: input, shape index: {}]   ;;  %s3135_s2 = inlined_call_operand.hbm [shape: bf16[1536,256], index: 2, kind: input, shape index: {}]   ;;  %s3136_s3 = inlined_call_operand.hbm [shape: f32[4,256], index: 3, kind: input, shape index: {}]   ;;  %s3137_s4 = inlined_call_operand.hbm [shape: f32[128,128], index: 4, kind: input, shape index: {}]   ;;  %s3138_s5 = inlined_call_operand.vmem [shape: f32[1,128], index: 5, kind: input, shape index: {}]   ;;  %s3139_s6 = inlined_call_operand.hbm [shape: f32[2,1,128], index: 6, kind: output, shape index: {}]  }
   0x1   :  { %s12_s23 = sshll.u32 %s3133_s0, 4  ;;  %s13_s23 = int_to_ptr.hbm [resolvable:$true] %s12_s23 }
   0x2   :  { %15 = dma.hbm_to_smem %s13_s23, 16, %s2842_s24, [#allocation2] }
   0x3   :  { %2808 = dma.done.wait [#allocation2], 16 }
   0x4   :  { %2809 = vsyncadd [#allocation2], 4294967280 }
   0x5   :  { %18 = sfence }
   0x6   :  { %19 = vsyncpa [#allocation5], 0 }
   0x7   :  { %21 = vsyncpa [#allocation5 + $0x1], 0 }
   0x8   :  { %22 = vsyncpa [#allocation8], 0 }
   0x9   :  { %23 = vsyncpa [#allocation11], 0 }
   0xa   :  { %24 = vsyncpa [#allocation6], 0 }
   0xb   :  { %26 = vsyncpa [#allocation6 + $0x1], 0  ;;  %s2886_s25 = smov 0   ;;  %s2888_s26 = smov 0  }
   0xc   :  { %s2890_s27 = smov 0   ;;  %s2892_s28 = smov 0  }
   0xd LB: > { %s184_s30 = sshll.u32 %s3135_s2, 4  ;;  %s2910_s7 = sadd.s32 4294967295, %s2840_s28   ;;  %s2840_s28 = sphi %s2892_s28, %s3158_s28   ;;  %s2836_s27 = sphi %s2890_s27, %s3157_s27   ;;  %s2832_s26 = sphi %s2888_s26, %s3156_s26   ;;  %s2828_s25 = sphi %s2886_s25, %s3155_s25   ;;  %s185_s30 = int_to_ptr.hbm [resolvable:$true] %s184_s30 }
   0xe   : > { %p1777_p0 = scmp.ge.s32.totalorder %s2840_s28, 1  ;;  %p53_p1 = scmp.eq.s32.totalorder %s2910_s7, 0 }
   0xf   : > { %p173_p2 = scmp.lt.s32.totalorder %s2840_s28, 3  ;;  %s2843_s9 = smov [#allocation7]  }
  0x10   : > { %s186_s10 = sshll.u32 %s2843_s9, 4  ;;  %s199_s13 = sshll.u32 %s3136_s3, 4  ;;  %s187_s10 = int_to_ptr.vmem [resolvable:$true] %s186_s10  ;;  %s200_s13 = int_to_ptr.hbm [resolvable:$true] %s199_s13 }
  0x11   : > { %p2915_p3 = pnand %p1777_p0, %p173_p2  ;;  %s210_s17 = sshll.u32 %s3137_s4, 4  ;;  %s211_s17 = int_to_ptr.hbm [resolvable:$true] %s210_s17 }
  0x12   : > { %s2844_s18 = smov [#allocation9]   ;;  %s2845_s20 = smov 128  }
  0x13   : > { %p2564_p4 = pneg %p2915_p3  ;;  %s201_s19 = sshll.u32 %s2844_s18, 4  ;;  %s202_s19 = int_to_ptr.vmem [resolvable:$true] %s201_s19 }
  0x14   : > { %s2846_s21 = smov 8   ;;  %s2847_s22 = smov [#allocation10]  }
  0x15   : > { %p2927_p6 = pnand %p2564_p4, %p53_p1  ;;  %s212_s23 = sshll.u32 %s2847_s22, 4  ;;  %s213_s23 = int_to_ptr.vmem [resolvable:$true] %s212_s23 }
  0x16   : > { %s1776_s24 = sadd.s32 4294967294, %s2840_s28   ;;  %s2942_s0 = sadd.s32 1, %s2840_s28  }
  0x17   : > { %2567 = dma.hbm_to_vmem [thread:$0]  (!%p2927_p6), %s185_s30, 24576, %s187_s10, [#allocation8], %s2845_s20, %s2845_s20, %s2846_s21  }
  0x18   : > { %2570 = dma.hbm_to_vmem [thread:$0]  (!%p2927_p6), %s200_s13, 128, %s202_s19, [#allocation8]  }
  0x19   : > { %2573 = dma.hbm_to_vmem [thread:$0]  (!%p2927_p6), %s211_s17, 2048, %s213_s23, [#allocation11], %s2845_s20, %s2845_s20, %s2846_s21  }
  0x1a   : > { %s39_s29 = sadd.s32 1, %s2836_s27  ;;  %s36_s30 = ssub.s32 %s2840_s28, %s2942_s0 }
  0x1b   : > { %p46_p7 = scmp.ne.s32.totalorder %s2836_s27, %s2832_s26  ;;  %p37_p8 = scmp.eq.s32.totalorder %s36_s30, 0 }
  0x1c   : > { %p47_p9 = scmp.eq.s32.totalorder %s2840_s28, 0  ;;  %p52_p10 = scmp.ne.s32.totalorder %s2832_s26, %s2828_s25 }
  0x1d   : > { %p160_p11 = scmp.eq.s32.totalorder %s2910_s7, 1  ;;  %p166_p0 = scmp.eq.s32.totalorder %s1776_s24, 1 }
  0x1e   : > { %s2954_s9 = scalar_select %p37_p8, %s2836_s27, %s39_s29  }
  0x1f   : > { %p2958_p12 = por %p53_p1, %p52_p10  ;;  %p2962_p13 = por %p160_p11, %p46_p7 }
  0x20   : > { %p48_p2 = por %p47_p9, %p46_p7  ;;  %s229_s12 = sand.u32 1, %s2836_s27  }
  0x21   : > { %p2967_p4 = por %p166_p0, %p52_p10  ;;  %p2585_p6 = scmp.lt.s32.totalorder %s2840_s28, 2 }
  0x22   : > { %s1782_s14 = sshll.u32 %s229_s12, 2  ;;  %s1783_s15 = sshll.u32 %s2840_s28, 2 }
  0x23   : > { %s237_s18 = scalar_lea.hbm %s3134_s1, %s1783_s15  ;;  %s233_s20 = scalar_lea.vmem [#allocation4], %s1782_s14 }
  0x24   : > { %s239_s19 = sshll.u32 %s237_s18, 4  ;;  %s241_s21 = sshll.u32 %s233_s20, 4  ;;  %s240_s19 = int_to_ptr.hbm [resolvable:$true] %s239_s19  ;;  %s242_s21 = int_to_ptr.vmem [resolvable:$true] %s241_s21 }
  0x25   : > { %p2976_p8 = pnand %p2585_p6, %p48_p2  ;;  %s230_s23 = scalar_lea.sflag [#allocation5], %s229_s12 }
  0x26   : > { %s2734_s24 = sshra.s32 %s240_s19, 4  ;;  %s2741_s14 = scalar_lea.hbm %s3134_s1, 8  ;;  %s2735_s24 = int_to_ptr.hbm [resolvable:$true] %s2734_s24 }
  0x27   : > { %s2736_s29 = scalar_lea.hbm %s2735_s24, 4  ;;  %p2738_p9 = pneg %p2976_p8 }
  0x28   : > { %p2737_p7 = scmp.ne.s32.totalorder %s2735_s24, %s2736_s29  ;;  %p2742_p0 = scmp.lt.s32.totalorder %s2735_s24, %s3134_s1 }
  0x29   : > { %p2743_p2 = scmp.lt.s32.totalorder %s2741_s14, %s2736_s29 }
  0x2a   : > { %p2739_p10 = pnand %p2738_p9, %p2737_p7 }
  0x2b   : > { %p2744_p6 = por %p2743_p2, %p2742_p0 }
  0x2c   : > { %p2740_p11 = pneg %p2739_p10 }
  0x2e   : > { %p2745_p5 = pnand %p2744_p6, %p2740_p11 }
  0x30   : > { %2748 = shalt.err (!%p2745_p5)
}
  0x31   : > { %2577 = dma.hbm_to_vmem [thread:$0]  (!%p2976_p8), %s240_s19, 64, %s242_s21, %s230_s23  }
  0x32   : > { %250 = sbr.rel (%p2915_p3) target bundleno = 943 (0x3af), region = 40  ;;  %s2993_s12 = sand.u32 (!%p2915_p3), 1, %s2832_s26  }
  0x33   : > { %s1785_s18 = sshll.u32 (!%p2915_p3), %s2993_s12, 2  ;;  %s253_s20 = scalar_lea.sflag (!%p2915_p3), [#allocation5], %s2993_s12 }
  0x34   : > { %s2997_s30 = scalar_lea.vmem (!%p2915_p3), [#allocation4], %s1785_s18 }
  0x37   : > { %2811 = dma.done.wait (%p2958_p12), %s253_s20, 64  }
  0x38   : > { %2813 = vsyncadd (%p2958_p12), %s253_s20, 4294967232 }
  0x39   : > { %2815 = dma.done.wait (%p53_p1), [#allocation8], 24704  }
  0x3a   : > { %2817 = vsyncadd (%p53_p1), [#allocation8], 4294942592 }
  0x3b   : > { %2819 = dma.done.wait (%p53_p1), [#allocation11], 2048  }
  0x3c   : > { %2821 = vsyncadd (%p53_p1), [#allocation11], 4294965248  ;;  %v1847_v0 = vld [vmem:[#allocation7 + $0x170] sm:$0xf]  ;;  %v2451_v1 = vld [vmem:[#allocation7 + $0x174] sm:$0xf0]  ;;  %v298_v45 = vlaneseq  ;;  %s1677_s21 = scalar_lea.hbm %s3139_s6, %s2910_s7 }
  0x3d   : > { %v1911_v2 = vld [vmem:[#allocation7 + $0x70] sm:$0xf]  ;;  %v1848_v3 = vor.u32 %v2451_v1, %v1847_v0  ;;  %v2419_v4 = vld [vmem:[#allocation7 + $0x74] sm:$0xf0]  ;;  %v1839_v9 = vld [vmem:[#allocation7 + $0x160] sm:$0xf] }
  0x3e   : > { %v1975_v5 = vld [vmem:[#allocation7 + $0xf0] sm:$0xf]  ;;  %v2435_v6 = vld [vmem:[#allocation7 + $0xf4] sm:$0xf0]  ;;  %v1912_v7 = vor.u32 %v2419_v4, %v1911_v2  ;;  %v2449_v10 = vld [vmem:[#allocation7 + $0x164] sm:$0xf0] }
  0x3f   : > { %v1976_v8 = vor.u32 %v2435_v6, %v1975_v5  ;;  %v1903_v11 = vld [vmem:[#allocation7 + $0x60] sm:$0xf]  ;;  %454 = vmatpush.bf16.msra.mxu0 %v1848_v3  ;;  %v1840_v12 = vor.u32 %v2449_v10, %v1839_v9  ;;  %v2417_v13 = vld [vmem:[#allocation7 + $0x64] sm:$0xf0]  ;;  %v1831_v18 = vld [vmem:[#allocation7 + $0x150] sm:$0xf] }
  0x40   : > { %v1967_v14 = vld [vmem:[#allocation7 + $0xe0] sm:$0xf]  ;;  %v2433_v15 = vld [vmem:[#allocation7 + $0xe4] sm:$0xf0]  ;;  %640 = vmatpush.bf16.msra.mxu2 %v1912_v7  ;;  %v1904_v16 = vor.u32 %v2417_v13, %v1903_v11  ;;  %v2447_v19 = vld [vmem:[#allocation7 + $0x154] sm:$0xf0] }
  0x41   : > { %653 = vmatpush.bf16.msra.mxu3 %v1976_v8  ;;  %v1968_v17 = vor.u32 %v2433_v15, %v1967_v14  ;;  %v1895_v20 = vld [vmem:[#allocation7 + $0x50] sm:$0xf]  ;;  %v2415_v21 = vld [vmem:[#allocation7 + $0x54] sm:$0xf0]  ;;  %v1832_v24 = vor.u32 %v2447_v19, %v1831_v18  ;;  %v1823_v27 = vld [vmem:[#allocation7 + $0x140] sm:$0xf] }
  0x42   : > { %v1959_v22 = vld [vmem:[#allocation7 + $0xd0] sm:$0xf]  ;;  %v2431_v23 = vld [vmem:[#allocation7 + $0xd4] sm:$0xf0]  ;;  %v1896_v25 = vor.u32 %v2415_v21, %v1895_v20  ;;  %v2445_v28 = vld [vmem:[#allocation7 + $0x144] sm:$0xf0] }
  0x43   : > { %455 = vmatpush.bf16.msra.mxu0 %v1840_v12  ;;  %v1960_v26 = vor.u32 %v2431_v23, %v1959_v22  ;;  %v1887_v29 = vld [vmem:[#allocation7 + $0x40] sm:$0xf]  ;;  %v2413_v30 = vld [vmem:[#allocation7 + $0x44] sm:$0xf0]  ;;  %v1824_v33 = vor.u32 %v2445_v28, %v1823_v27  ;;  %v1815_v36 = vld [vmem:[#allocation7 + $0x130] sm:$0xf] }
  0x44   : > { %641 = vmatpush.bf16.msra.mxu2 %v1904_v16  ;;  %v1951_v31 = vld [vmem:[#allocation7 + $0xc0] sm:$0xf]  ;;  %v2429_v32 = vld [vmem:[#allocation7 + $0xc4] sm:$0xf0]  ;;  %v1888_v34 = vor.u32 %v2413_v30, %v1887_v29  ;;  %v2443_v37 = vld [vmem:[#allocation7 + $0x134] sm:$0xf0] }
  0x45   : > { %654 = vmatpush.bf16.msra.mxu3 %v1968_v17  ;;  %v1952_v35 = vor.u32 %v2429_v32, %v1951_v31  ;;  %v1879_v38 = vld [vmem:[#allocation7 + $0x30] sm:$0xf]  ;;  %v2411_v39 = vld [vmem:[#allocation7 + $0x34] sm:$0xf0]  ;;  %v1816_v42 = vor.u32 %v2443_v37, %v1815_v36  ;;  %v1807_v43 = vld [vmem:[#allocation7 + $0x120] sm:$0xf] }
  0x46   : > { %v1943_v40 = vld [vmem:[#allocation7 + $0xb0] sm:$0xf]  ;;  %v2427_v41 = vld [vmem:[#allocation7 + $0xb4] sm:$0xf0]  ;;  %v2441_v44 = vld [vmem:[#allocation7 + $0x124] sm:$0xf0]  ;;  %v1880_v46 = vor.u32 %v2411_v39, %v1879_v38 }
  0x47   : > { %456 = vmatpush.bf16.msra.mxu0 %v1832_v24  ;;  %v1944_v47 = vor.u32 %v2427_v41, %v1943_v40  ;;  %v1871_v48 = vld [vmem:[#allocation7 + $0x20] sm:$0xf]  ;;  %v2409_v49 = vld [vmem:[#allocation7 + $0x24] sm:$0xf0]  ;;  %v2450_v50 = vld [vmem:[#allocation7 + $0x174] sm:$0xf]  ;;  %v1808_v57 = vor.u32 %v2441_v44, %v1807_v43 }
  0x48   : > { %642 = vmatpush.bf16.msra.mxu2 %v1896_v25  ;;  %v1935_v51 = vld [vmem:[#allocation7 + $0xa0] sm:$0xf]  ;;  %v2425_v52 = vld [vmem:[#allocation7 + $0xa4] sm:$0xf0]  ;;  %v1849_v53 = vld [vmem:[#allocation7 + $0x178] sm:$0xf0]  ;;  %v1872_v60 = vor.u32 %v2409_v49, %v1871_v48 }
  0x49   : > { %655 = vmatpush.bf16.msra.mxu3 %v1960_v26  ;;  %v1852_v54 = vor.u32 %v2450_v50, %v1849_v53  ;;  %v2448_v55 = vld [vmem:[#allocation7 + $0x164] sm:$0xf]  ;;  %v1841_v56 = vld [vmem:[#allocation7 + $0x168] sm:$0xf0]  ;;  %v1799_v58 = vld [vmem:[#allocation7 + $0x110] sm:$0xf]  ;;  %v1936_v61 = vor.u32 %v2425_v52, %v1935_v51 }
  0x4a   : > { %v3012_v59 = vshrl.u32 %v298_v45, 7  ;;  %v2439_v62 = vld [vmem:[#allocation7 + $0x114] sm:$0xf0]  ;;  %v1863_v63 = vld [vmem:[#allocation7 + $0x10] sm:$0xf]  ;;  %v1844_v4 = vor.u32 %v2448_v55, %v1841_v56  ;;  %s1582_s8 = sld [smem:[#allocation3 + %s2910_s7]] }
  0x4b   : > { %457 = vmatpush.bf16.msra.mxu0 %v1824_v33  ;;  %v3015_v0 = vld [vmem:[%s2997_s30] sm:$0xf]  ;;  %v1927_v2 = vld [vmem:[#allocation7 + $0x90] sm:$0xf]  ;;  %467 = vmatpush.bf16.msra.mxu1 %v1852_v54  ;;  %v2446_v5 = vld [vmem:[#allocation7 + $0x154] sm:$0xf]  ;;  %v1800_v7 = vor.u32 %v2439_v62, %v1799_v58 }
  0x4c   : > { %643 = vmatpush.bf16.msra.mxu2 %v1888_v34  ;;  %v2407_v1 = vld [vmem:[#allocation7 + $0x14] sm:$0xf0]  ;;  %v1833_v6 = vld [vmem:[#allocation7 + $0x158] sm:$0xf0]  ;;  %v1791_v8 = vld [vmem:[#allocation7 + $0x100] sm:$0xf]  ;;  %v313_v9 = vunpack.c.l.bf16 %v3015_v0 }
  0x4d   : > { %656 = vmatpush.bf16.msra.mxu3 %v1952_v35  ;;  %v2423_v3 = vld [vmem:[#allocation7 + $0x94] sm:$0xf0]  ;;  %v3019_v10 = vand.u32 7, %v3012_v59  ;;  %v1864_v11 = vor.u32 %v2407_v1, %v1863_v63  ;;  %v2437_v13 = vld [vmem:[#allocation7 + $0x104] sm:$0xf0]  ;;  %v1836_v19 = vor.u32 %v2446_v5, %v1833_v6  ;;  %vm1583_vm6 = vcmp.eq.s32.totalorder %v3012_v59, 0 }
  0x4e   : > { %v1928_v12 = vor.u32 %v2423_v3, %v1927_v2  ;;  %v1855_v14 = vld [vmem:[#allocation7] sm:$0xf]  ;;  %v2405_v15 = vld [vmem:[#allocation7 + $0x4] sm:$0xf0]  ;;  %v2418_v18 = vld [vmem:[#allocation7 + $0x74] sm:$0xf]  ;;  %v1792_v23 = vor.u32 %v2437_v13, %v1791_v8 }
  0x4f   : > { %458 = vmatpush.bf16.msra.mxu0 %v1816_v42  ;;  %v1919_v16 = vld [vmem:[#allocation7 + $0x80] sm:$0xf]  ;;  %v2421_v17 = vld [vmem:[#allocation7 + $0x84] sm:$0xf0]  ;;  %468 = vmatpush.bf16.msra.mxu1 %v1844_v4  ;;  %v1913_v20 = vld [vmem:[#allocation7 + $0x78] sm:$0xf0]  ;;  %v1856_v26 = vor.u32 %v2405_v15, %v1855_v14 }
  0x50   : > { %644 = vmatpush.bf16.msra.mxu2 %v1880_v46  ;;  %v2444_v21 = vld [vmem:[#allocation7 + $0x144] sm:$0xf]  ;;  %v1825_v22 = vld [vmem:[#allocation7 + $0x148] sm:$0xf0]  ;;  %v314_v24 = vrot.slane %v313_v9, 6  ;;  %v320_v25 = vrot.slane %v313_v9, 7  ;;  %v1920_v27 = vor.u32 %v2421_v17, %v1919_v16  ;;  %v1916_v30 = vor.u32 %v2418_v18, %v1913_v20 }
  0x51   : > { %657 = vmatpush.bf16.msra.mxu3 %v1944_v47  ;;  %vm315_vm0 = vcmp.ge.s32.totalorder %v3019_v10, 2  ;;  %vm321_vm1 = vcmp.ge.s32.totalorder %v3019_v10, 1  ;;  %v2416_v28 = vld [vmem:[#allocation7 + $0x64] sm:$0xf]  ;;  %v1905_v29 = vld [vmem:[#allocation7 + $0x68] sm:$0xf0]  ;;  %v1828_v31 = vor.u32 %v2444_v21, %v1825_v22 }
  0x52   : > { %v2442_v32 = vld [vmem:[#allocation7 + $0x134] sm:$0xf]  ;;  %v2023_v33 = vld [vmem:[#allocation7 + $0x2f0] sm:$0xf]  ;;  %v2475_v34 = vld [vmem:[#allocation7 + $0x2f4] sm:$0xf0]  ;;  %v3027_v40 = vpack.c.bf16 %v314_v24, %v314_v24  ;;  %v3029_v41 = vpack.c.bf16 %v320_v25, %v320_v25  ;;  %v1908_v47 = vor.u32 %v2416_v28, %v1905_v29 }
  0x53   : > { %459 = vmatpush.bf16.msra.mxu0 %v1808_v57  ;;  %469 = vmatpush.bf16.msra.mxu1 %v1836_v19  ;;  %v1817_v35 = vld [vmem:[#allocation7 + $0x138] sm:$0xf0]  ;;  %v2024_v36 = vor.u32 %v2475_v34, %v2023_v33  ;;  %v2055_v37 = vld [vmem:[#allocation7 + $0x1f0] sm:$0xf]  ;;  %v2459_v38 = vld [vmem:[#allocation7 + $0x1f4] sm:$0xf0] }
  0x54   : > { %645 = vmatpush.bf16.msra.mxu2 %v1872_v60  ;;  %vm3023_vm2 = vmpackc.low %vm315_vm0, %vm315_vm0  ;;  %v2056_v43 = vor.u32 %v2459_v38, %v2055_v37  ;;  %v2019_v44 = vld [vmem:[#allocation7 + $0x2e0] sm:$0xf]  ;;  %v2474_v46 = vld [vmem:[#allocation7 + $0x2e4] sm:$0xf0]  ;;  %v1820_v49 = vor.u32 %v2442_v32, %v1817_v35  ;;  %vm946_vm4 = vcmp.ge.s32.totalorder %v3019_v10, 4  ;;  %vm1606_vm0 = vcmask 64512  }
  0x55   : > { %658 = vmatpush.bf16.msra.mxu3 %v1936_v61  ;;  %vm3034_vm3 = vmpackc.low %vm321_vm1, %vm321_vm1  ;;  %v2414_v48 = vld [vmem:[#allocation7 + $0x54] sm:$0xf]  ;;  %v2051_v50 = vld [vmem:[#allocation7 + $0x1e0] sm:$0xf]  ;;  %v2020_v55 = vor.u32 %v2474_v46, %v2019_v44  ;;  %s297_s24 = scalar_lea.vmem [#allocation12], %s2993_s12  ;;  %s1681_s15 = sshll.u32 %s1677_s21, 4  ;;  %s1682_s15 = int_to_ptr.hbm [resolvable:$true] %s1681_s15 }
  0x56   : > { %v2458_v51 = vld [vmem:[#allocation7 + $0x1e4] sm:$0xf0]  ;;  %v1897_v52 = vld [vmem:[#allocation7 + $0x58] sm:$0xf0]  ;;  %v2440_v53 = vld [vmem:[#allocation7 + $0x124] sm:$0xf] }
  0x57   : > { %460 = vmatpush.bf16.msra.mxu0 %v1800_v7  ;;  %470 = vmatpush.bf16.msra.mxu1 %v1828_v31  ;;  %v1809_v54 = vld [vmem:[#allocation7 + $0x128] sm:$0xf0]  ;;  %v2015_v56 = vld [vmem:[#allocation7 + $0x2d0] sm:$0xf]  ;;  %v2473_v57 = vld [vmem:[#allocation7 + $0x2d4] sm:$0xf0]  ;;  %v2052_v60 = vor.u32 %v2458_v51, %v2051_v50  ;;  %v1900_v62 = vor.u32 %v2414_v48, %v1897_v52 }
  0x58   : > { %646 = vmatpush.bf16.msra.mxu2 %v1864_v11  ;;  %v2412_v58 = vld [vmem:[#allocation7 + $0x44] sm:$0xf]  ;;  %v2047_v61 = vld [vmem:[#allocation7 + $0x1d0] sm:$0xf]  ;;  %v1812_v63 = vor.u32 %v2440_v53, %v1809_v54  ;;  %v2457_v1 = vld [vmem:[#allocation7 + $0x1d4] sm:$0xf0]  ;;  %v2016_v5 = vor.u32 %v2473_v57, %v2015_v56 }
  0x59   : > { %659 = vmatpush.bf16.msra.mxu3 %v1928_v12  ;;  %v1889_v2 = vld [vmem:[#allocation7 + $0x48] sm:$0xf0]  ;;  %v2438_v3 = vld [vmem:[#allocation7 + $0x114] sm:$0xf]  ;;  %v1801_v4 = vld [vmem:[#allocation7 + $0x118] sm:$0xf0]  ;;  %v2048_v8 = vor.u32 %v2457_v1, %v2047_v61 }
  0x5a   : > { %v2011_v6 = vld [vmem:[#allocation7 + $0x2c0] sm:$0xf]  ;;  %v2472_v7 = vld [vmem:[#allocation7 + $0x2c4] sm:$0xf0]  ;;  %v1892_v9 = vor.u32 %v2412_v58, %v1889_v2  ;;  %v2410_v11 = vld [vmem:[#allocation7 + $0x34] sm:$0xf]  ;;  %v1804_v12 = vor.u32 %v2438_v3, %v1801_v4 }
  0x5b   : > { %461 = vmatpush.bf16.msra.mxu0 %v1792_v23  ;;  %471 = vmatpush.bf16.msra.mxu1 %v1820_v49  ;;  %v1881_v13 = vld [vmem:[#allocation7 + $0x38] sm:$0xf0]  ;;  %v2436_v14 = vld [vmem:[#allocation7 + $0x104] sm:$0xf]  ;;  %v1793_v15 = vld [vmem:[#allocation7 + $0x108] sm:$0xf0]  ;;  %v2012_v16 = vor.u32 %v2472_v7, %v2011_v6 }
  0x5c   : > { %647 = vmatpush.bf16.msra.mxu2 %v1856_v26  ;;  %v2434_v17 = vld [vmem:[#allocation7 + $0xf4] sm:$0xf]  ;;  %v1977_v18 = vld [vmem:[#allocation7 + $0xf8] sm:$0xf0]  ;;  %v1884_v19 = vor.u32 %v2410_v11, %v1881_v13  ;;  %v1796_v20 = vor.u32 %v2436_v14, %v1793_v15  ;;  %v2408_v21 = vld [vmem:[#allocation7 + $0x24] sm:$0xf] }
  0x5d   : > { %660 = vmatpush.bf16.msra.mxu3 %v1920_v27  ;;  %v1873_v22 = vld [vmem:[#allocation7 + $0x28] sm:$0xf0]  ;;  %v1980_v23 = vor.u32 %v2434_v17, %v1977_v18  ;;  %v2432_v24 = vld [vmem:[#allocation7 + $0xe4] sm:$0xf]  ;;  %v2406_v27 = vld [vmem:[#allocation7 + $0x14] sm:$0xf] }
  0x5e   : > { %462 = vmatmul.bf16.vlgmr.msra.gmra.mxu0 %v3015_v0  ;;  %v1969_v25 = vld [vmem:[#allocation7 + $0xe8] sm:$0xf0]  ;;  %v1876_v26 = vor.u32 %v2408_v21, %v1873_v22  ;;  %v1865_v28 = vld [vmem:[#allocation7 + $0x18] sm:$0xf0]  ;;  %v2404_v33 = vld [vmem:[#allocation7 + $0x4] sm:$0xf] }
  0x5f   : > { %666 = vmatpush.bf16.msrb.mxu0 %v1916_v30  ;;  %1983 = vmatmul.msk.bf16.vlgmr.msra.gmra.mxu2 %vm3023_vm2, %v3027_v40  ;;  %v1972_v29 = vor.u32 %v2432_v24, %v1969_v25  ;;  %v2430_v30 = vld [vmem:[#allocation7 + $0xd4] sm:$0xf]  ;;  %v1961_v31 = vld [vmem:[#allocation7 + $0xd8] sm:$0xf0]  ;;  %v1868_v32 = vor.u32 %v2406_v27, %v1865_v28  ;;  %v1857_v34 = vld [vmem:[#allocation7 + $0x8] sm:$0xf0] }
  0x60   : > { %804 = vmatpush.bf16.msrb.mxu2 %v2024_v36  ;;  %1986 = vmatmul.msk.bf16.vlgmr.msra.gmra.mxu3 %vm3034_vm3, %v3029_v41  ;;  %v2087_v35 = vld [vmem:[#allocation7 + $0x270] sm:$0xf]  ;;  %v1964_v36 = vor.u32 %v2430_v30, %v1961_v31  ;;  %v2467_v37 = vld [vmem:[#allocation7 + $0x274] sm:$0xf0]  ;;  %v2428_v38 = vld [vmem:[#allocation7 + $0xc4] sm:$0xf]  ;;  %v1860_v44 = vor.u32 %v2404_v33, %v1857_v34 }
  0x61   : > { %913 = vmatpush.bf16.msrb.mxu3 %v2056_v43  ;;  %472 = vmatpush.bf16.msra.mxu1 %v1812_v63  ;;  %v1953_v43 = vld [vmem:[#allocation7 + $0xc8] sm:$0xf0]  ;;  %v2088_v46 = vor.u32 %v2467_v37, %v2087_v35  ;;  %v2466_v49 = vld [vmem:[#allocation7 + $0x264] sm:$0xf0]  ;;  %v2426_v50 = vld [vmem:[#allocation7 + $0xb4] sm:$0xf] }
  0x62   : > { %v1956_v48 = vor.u32 %v2428_v38, %v1953_v43  ;;  %v1945_v51 = vld [vmem:[#allocation7 + $0xb8] sm:$0xf0]  ;;  %v2079_v53 = vld [vmem:[#allocation7 + $0x250] sm:$0xf]  ;;  %v2465_v54 = vld [vmem:[#allocation7 + $0x254] sm:$0xf0] }
  0x63   : > { %667 = vmatpush.bf16.msrb.mxu0 %v1908_v47  ;;  %v2083_v47 = vld [vmem:[#allocation7 + $0x260] sm:$0xf]  ;;  %v1948_v52 = vor.u32 %v2426_v50, %v1945_v51  ;;  %v2456_v57 = vld [vmem:[#allocation7 + $0x1c4] sm:$0xf0]  ;;  %v2424_v63 = vld [vmem:[#allocation7 + $0xa4] sm:$0xf] }
  0x64   : > { %805 = vmatpush.bf16.msrb.mxu2 %v2020_v55  ;;  %v2080_v55 = vor.u32 %v2465_v54, %v2079_v53  ;;  %v2043_v56 = vld [vmem:[#allocation7 + $0x1c0] sm:$0xf]  ;;  %v2464_v61 = vld [vmem:[#allocation7 + $0x244] sm:$0xf0]  ;;  %v1937_v1 = vld [vmem:[#allocation7 + $0xa8] sm:$0xf0] }
  0x65   : > { %914 = vmatpush.bf16.msrb.mxu3 %v2052_v60  ;;  %473 = vmatpush.bf16.msra.mxu1 %v1804_v12  ;;  %v2075_v58 = vld [vmem:[#allocation7 + $0x240] sm:$0xf]  ;;  %v2044_v60 = vor.u32 %v2456_v57, %v2043_v56  ;;  %v2007_v2 = vld [vmem:[#allocation7 + $0x2b0] sm:$0xf]  ;;  %v1940_v3 = vor.u32 %v2424_v63, %v1937_v1  ;;  %v2471_v4 = vld [vmem:[#allocation7 + $0x2b4] sm:$0xf0] }
  0x66   : > { %v2455_v6 = vld [vmem:[#allocation7 + $0x1b4] sm:$0xf0]  ;;  %v2422_v12 = vld [vmem:[#allocation7 + $0x94] sm:$0xf]  ;;  %v1929_v13 = vld [vmem:[#allocation7 + $0x98] sm:$0xf0] }
  0x67   : > { %668 = vmatpush.bf16.msrb.mxu0 %v1900_v62  ;;  %v2076_v62 = vor.u32 %v2464_v61, %v2075_v58  ;;  %v2003_v14 = vld [vmem:[#allocation7 + $0x2a0] sm:$0xf]  ;;  %v1932_v15 = vor.u32 %v2422_v12, %v1929_v13  ;;  %v2462_v22 = vld [vmem:[#allocation7 + $0x224] sm:$0xf0]  ;;  %v2420_v24 = vld [vmem:[#allocation7 + $0x84] sm:$0xf] }
  0x68   : > { %806 = vmatpush.bf16.msrb.mxu2 %v2016_v5  ;;  %v2039_v5 = vld [vmem:[#allocation7 + $0x1b0] sm:$0xf]  ;;  %v2035_v18 = vld [vmem:[#allocation7 + $0x1a0] sm:$0xf]  ;;  %v1921_v25 = vld [vmem:[#allocation7 + $0x88] sm:$0xf0] }
  0x69   : > { %915 = vmatpush.bf16.msrb.mxu3 %v2048_v8  ;;  %474 = vmatpush.bf16.msra.mxu1 %v1796_v20  ;;  %v2040_v7 = vor.u32 %v2455_v6, %v2039_v5  ;;  %v2071_v8 = vld [vmem:[#allocation7 + $0x230] sm:$0xf]  ;;  %v2067_v20 = vld [vmem:[#allocation7 + $0x220] sm:$0xf]  ;;  %v1924_v27 = vor.u32 %v2420_v24, %v1921_v25  ;;  %v2469_v28 = vld [vmem:[#allocation7 + $0x294] sm:$0xf0] }
  0x6a   : > { %v2031_v30 = vld [vmem:[#allocation7 + $0x190] sm:$0xf]  ;;  %v2453_v31 = vld [vmem:[#allocation7 + $0x194] sm:$0xf0]  ;;  %v2468_v37 = vld [vmem:[#allocation7 + $0x284] sm:$0xf0] }
  0x6b   : > { %669 = vmatpush.bf16.msrb.mxu0 %v1892_v9  ;;  %v2463_v9 = vld [vmem:[#allocation7 + $0x234] sm:$0xf0]  ;;  %v2063_v33 = vld [vmem:[#allocation7 + $0x210] sm:$0xf]  ;;  %v2027_v43 = vld [vmem:[#allocation7 + $0x180] sm:$0xf] }
  0x6c   : > { %807 = vmatpush.bf16.msrb.mxu2 %v2012_v16  ;;  %475 = vmatmul.bf16.vlgmr.msra.gmra.mxu1 %v3015_v0  ;;  %v2084_v0 = vor.u32 %v2466_v49, %v2083_v47  ;;  %v2072_v11 = vor.u32 %v2463_v9, %v2071_v8  ;;  %v2470_v16 = vld [vmem:[#allocation7 + $0x2a4] sm:$0xf0]  ;;  %v2461_v34 = vld [vmem:[#allocation7 + $0x214] sm:$0xf0]  ;;  %v2153_v50 = vld [vmem:[#allocation7 + $0x470] sm:$0xf] }
  0x6d   : > { %679 = vmatpush.bf16.msrb.mxu1 %v1980_v23  ;;  %916 = vmatpush.bf16.msrb.mxu3 %v2044_v60  ;;  %v2004_v17 = vor.u32 %v2470_v16, %v2003_v14  ;;  %v2068_v23 = vor.u32 %v2462_v22, %v2067_v20  ;;  %v2064_v35 = vor.u32 %v2461_v34, %v2063_v33  ;;  %v2523_v51 = vld [vmem:[#allocation7 + $0x474] sm:$0xf0]  ;;  %v2155_v53 = vld [vmem:[#allocation7 + $0x478] sm:$0xf0]  ;;  %v2145_v54 = vld [vmem:[#allocation7 + $0x460] sm:$0xf] }
  0x6e   : > { %v2520_v57 = vld [vmem:[#allocation7 + $0x464] sm:$0xf]  ;;  %v2147_v58 = vld [vmem:[#allocation7 + $0x468] sm:$0xf0]  ;;  %v2137_v61 = vld [vmem:[#allocation7 + $0x450] sm:$0xf] }
  0x6f   : > { %670 = vmatpush.bf16.msrb.mxu0 %v1884_v19  ;;  %v2454_v19 = vld [vmem:[#allocation7 + $0x1a4] sm:$0xf0]  ;;  %v2150_v60 = vor.u32 %v2520_v57, %v2147_v58  ;;  %v2518_v63 = vld [vmem:[#allocation7 + $0x454] sm:$0xf]  ;;  %v2217_v12 = vld [vmem:[#allocation7 + $0x370] sm:$0xf] }
  0x70   : > { %v2036_v21 = vor.u32 %v2454_v19, %v2035_v18  ;;  %v2517_v5 = vld [vmem:[#allocation7 + $0x444] sm:$0xf0]  ;;  %v2491_v13 = vld [vmem:[#allocation7 + $0x374] sm:$0xf0]  ;;  %v2281_v14 = vld [vmem:[#allocation7 + $0x3f0] sm:$0xf] }
  0x71   : > { %680 = vmatpush.bf16.msrb.mxu1 %v1972_v29  ;;  %917 = vmatpush.bf16.msrb.mxu3 %v2040_v7  ;;  %v2131_v7 = vld [vmem:[#allocation7 + $0x448] sm:$0xf0]  ;;  %v2507_v18 = vld [vmem:[#allocation7 + $0x3f4] sm:$0xf0]  ;;  %v2121_v19 = vld [vmem:[#allocation7 + $0x430] sm:$0xf] }
  0x72   : > { %v2515_v20 = vld [vmem:[#allocation7 + $0x434] sm:$0xf0]  ;;  %v2282_v24 = vor.u32 %v2507_v18, %v2281_v14  ;;  %v2512_v57 = vld [vmem:[#allocation7 + $0x424] sm:$0xf]  ;;  %v2115_v58 = vld [vmem:[#allocation7 + $0x428] sm:$0xf0] }
  0x73   : > { %671 = vmatpush.bf16.msrb.mxu0 %v1876_v26  ;;  %v1999_v26 = vld [vmem:[#allocation7 + $0x290] sm:$0xf]  ;;  %v2122_v25 = vor.u32 %v2515_v20, %v2121_v19  ;;  %v2501_v14 = vld [vmem:[#allocation7 + $0x3c4] sm:$0xf0]  ;;  %v2508_v20 = vld [vmem:[#allocation7 + $0x404] sm:$0xf] }
  0x74   : > { %v2000_v29 = vor.u32 %v2469_v28, %v1999_v26  ;;  %v2514_v26 = vld [vmem:[#allocation7 + $0x434] sm:$0xf]  ;;  %vm3067_vm5 = vmpackc.low %vm946_vm4, %vm946_vm4  ;;  %v2385_v10 = vld [vmem:[#allocation7 + $0x550] sm:$0xf]  ;;  %s1679_s29 = sshll.u32 %s297_s24, 4  ;;  %s1669_s14 = scalar_lea.sflag [#allocation6], %s2993_s12  ;;  %s1680_s29 = int_to_ptr.vmem [resolvable:$true] %s1679_s29 }
  0x75   : > { %681 = vmatpush.bf16.msrb.mxu1 %v1964_v36  ;;  %918 = vmatpush.bf16.msrb.mxu3 %v2036_v21  ;;  %v1995_v36 = vld [vmem:[#allocation7 + $0x280] sm:$0xf]  ;;  %v1643_v39 = vld [vmem:[#allocation10 + $0x68] sm:$0xff]  ;;  %s2778_s16 = sshra.s32 %s1682_s15, 4  ;;  %s2784_s20 = scalar_lea.hbm %s3139_s6, 2  ;;  %s2779_s16 = int_to_ptr.hbm [resolvable:$true] %s2778_s16 }
  0x76   : > { %v1996_v38 = vor.u32 %v2468_v37, %v1995_v36  ;;  %s2780_s17 = scalar_lea.hbm %s2779_s16, 1  ;;  %p2785_p12 = scmp.lt.s32.totalorder %s2779_s16, %s3139_s6 }
  0x77   : > { %672 = vmatpush.bf16.msrb.mxu0 %v1868_v32  ;;  %v2032_v32 = vor.u32 %v2453_v31, %v2031_v30  ;;  %p2781_p1 = scmp.ne.s32.totalorder %s2779_s16, %s2780_s17  ;;  %p2786_p8 = scmp.lt.s32.totalorder %s2784_s20, %s2780_s17 }
  0x79   : > { %682 = vmatpush.bf16.msrb.mxu1 %v1956_v48  ;;  %919 = vmatpush.bf16.msrb.mxu3 %v2032_v32  ;;  %v2460_v48 = vld [vmem:[#allocation7 + $0x204] sm:$0xf0]  ;;  %p2782_p3 = pnand %p2781_p1, %p2962_p13  ;;  %p2787_p7 = por %p2786_p8, %p2785_p12 }
  0x7b   : > { %673 = vmatpush.bf16.msrb.mxu0 %v1860_v44  ;;  %v2452_v44 = vld [vmem:[#allocation7 + $0x184] sm:$0xf0]  ;;  %p2783_p5 = pneg %p2782_p3 }
  0x7c   : > { %v2028_v47 = vor.u32 %v2452_v44, %v2027_v43 }
  0x7d   : > { %683 = vmatpush.bf16.msrb.mxu1 %v1948_v52  ;;  %v2154_v52 = vor.u32 %v2523_v51, %v2153_v50  ;;  %v2489_v50 = vld [vmem:[#allocation7 + $0x364] sm:$0xf0]  ;;  %v2273_v51 = vld [vmem:[#allocation7 + $0x3e0] sm:$0xf]  ;;  %p2788_p9 = pnand %p2787_p7, %p2783_p5 }
  0x7e   : > { %1989 = vmatmul.msk.bf16.vlgmr.msrb.gmra.mxu0 %vm3023_vm2, %v3027_v40  ;;  %v2008_v40 = vor.u32 %v2471_v4, %v2007_v2  ;;  %920 = vmatpush.bf16.msrb.mxu3 %v2028_v47  ;;  %v2129_v4 = vld [vmem:[#allocation7 + $0x440] sm:$0xf] }
  0x7f   : > { %926 = vmatpush.bf16.msra.mxu0 %v2088_v46  ;;  %v2059_v46 = vld [vmem:[#allocation7 + $0x200] sm:$0xf]  ;;  %v2130_v8 = vor.u32 %v2517_v5, %v2129_v4 }
  0x80   : > { %808 = vmatpush.bf16.msrb.mxu2 %v2008_v40  ;;  %v2060_v49 = vor.u32 %v2460_v48, %v2059_v46  ;;  %v2516_v40 = vld [vmem:[#allocation7 + $0x444] sm:$0xf] }
  0x81   : > { %684 = vmatpush.bf16.msrb.mxu1 %v1940_v3  ;;  %v2139_v3 = vld [vmem:[#allocation7 + $0x458] sm:$0xf0]  ;;  %v2134_v9 = vor.u32 %v2516_v40, %v2131_v7 }
  0x82   : > { %v2142_v6 = vor.u32 %v2518_v63, %v2139_v3  ;;  %v2511_v3 = vld [vmem:[#allocation7 + $0x414] sm:$0xf0]  ;;  %v2107_v40 = vld [vmem:[#allocation7 + $0x418] sm:$0xf0] }
  0x83   : > { %927 = vmatpush.bf16.msra.mxu0 %v2084_v0  ;;  %v2522_v0 = vld [vmem:[#allocation7 + $0x474] sm:$0xf] }
  0x84   : > { %809 = vmatpush.bf16.msrb.mxu2 %v2004_v17  ;;  %v2158_v56 = vor.u32 %v2522_v0, %v2155_v53  ;;  %v2218_v17 = vor.u32 %v2491_v13, %v2217_v12  ;;  %v2113_v53 = vld [vmem:[#allocation7 + $0x420] sm:$0xf] }
  0x85   : > { %685 = vmatpush.bf16.msrb.mxu1 %v1932_v15  ;;  %v2257_v12 = vld [vmem:[#allocation7 + $0x3c0] sm:$0xf] }
  0x86   : > { %1269 = vmatpush.bf16.msra.mxu3 %v2218_v17  ;;  %v2258_v18 = vor.u32 %v2501_v14, %v2257_v12  ;;  %v2493_v12 = vld [vmem:[#allocation7 + $0x384] sm:$0xf0]  ;;  %v2482_v14 = vld [vmem:[#allocation7 + $0x334] sm:$0xf] }
  0x87   : > { %928 = vmatpush.bf16.msra.mxu0 %v2080_v55  ;;  %v2521_v55 = vld [vmem:[#allocation7 + $0x464] sm:$0xf0] }
  0x88   : > { %810 = vmatpush.bf16.msrb.mxu2 %v2000_v29 }
  0x89   : > { %686 = vmatpush.bf16.msrb.mxu1 %v1924_v27  ;;  %v2123_v27 = vld [vmem:[#allocation7 + $0x438] sm:$0xf0] }
  0x8a   : > { %v2126_v28 = vor.u32 %v2514_v26, %v2123_v27  ;;  %v2283_v26 = vld [vmem:[#allocation7 + $0x3f8] sm:$0xf0] }
  0x8b   : > { %929 = vmatpush.bf16.msra.mxu0 %v2076_v62  ;;  %v2519_v62 = vld [vmem:[#allocation7 + $0x454] sm:$0xf0] }
  0x8c   : > { %1992 = vmatmul.msk.bf16.vlgmr.msrb.gmra.mxu1 %vm3034_vm3, %v3029_v41  ;;  %811 = vmatpush.bf16.msrb.mxu2 %v1996_v38  ;;  %v2146_v41 = vor.u32 %v2521_v55, %v2145_v54  ;;  %v2138_v2 = vor.u32 %v2519_v62, %v2137_v61  ;;  %v2513_v54 = vld [vmem:[#allocation7 + $0x424] sm:$0xf0]  ;;  %v2487_v61 = vld [vmem:[#allocation7 + $0x354] sm:$0xf0]  ;;  %v2265_v62 = vld [vmem:[#allocation7 + $0x3d0] sm:$0xf] }
  0x8d   : > { %1083 = vmatpush.bf16.msra.mxu1 %v2154_v52  ;;  %v2505_v52 = vld [vmem:[#allocation7 + $0x3e4] sm:$0xf0] }
  0x8e   : > { %v2274_v55 = vor.u32 %v2505_v52, %v2273_v51  ;;  %v2497_v51 = vld [vmem:[#allocation7 + $0x3a4] sm:$0xf0]  ;;  %v2486_v52 = vld [vmem:[#allocation7 + $0x354] sm:$0xf] }
  0x8f   : > { %930 = vmatpush.bf16.msra.mxu0 %v2072_v11  ;;  %v3052_v11 = vld [vmem:[#allocation9] ss:$4 sm:$0x3] }
  0x90   : > { %1096 = vmatpush.bf16.msra.mxu2 %v2158_v56  ;;  %v694_v22 = vperm.slane %v3052_v11, 0  ;;  %v2114_v56 = vor.u32 %v2513_v54, %v2113_v53  ;;  %v2203_v53 = vld [vmem:[#allocation7 + $0x358] sm:$0xf0]  ;;  %v2502_v54 = vld [vmem:[#allocation7 + $0x3d4] sm:$0xf] }
  0x91   : > { %1084 = vmatpush.bf16.msra.mxu1 %v2146_v41  ;;  %v2118_v41 = vor.u32 %v2512_v57, %v2115_v58  ;;  %v2169_v58 = vld [vmem:[#allocation7 + $0x310] sm:$0xf] }
  0x93   : > { %931 = vmatpush.bf16.msra.mxu0 %v2068_v23 }
  0x94   : > { %1097 = vmatpush.bf16.msra.mxu2 %v2150_v60  ;;  %v2201_v60 = vld [vmem:[#allocation7 + $0x350] sm:$0xf] }
  0x95   : > { %1085 = vmatpush.bf16.msra.mxu1 %v2138_v2  ;;  %v2202_v63 = vor.u32 %v2487_v61, %v2201_v60  ;;  %v2105_v2 = vld [vmem:[#allocation7 + $0x410] sm:$0xf] }
  0x96   : > { %v2106_v5 = vor.u32 %v2511_v3, %v2105_v2  ;;  %v2233_v60 = vld [vmem:[#allocation7 + $0x390] sm:$0xf]  ;;  %v2195_v2 = vld [vmem:[#allocation7 + $0x348] sm:$0xf0]  ;;  %v2500_v3 = vld [vmem:[#allocation7 + $0x3c4] sm:$0xf] }
  0x97   : > { %932 = vmatpush.bf16.msra.mxu0 %v2064_v35 }
  0x98   : > { %1098 = vmatpush.bf16.msra.mxu2 %v2142_v6  ;;  %v2510_v6 = vld [vmem:[#allocation7 + $0x414] sm:$0xf] }
  0x99   : > { %1086 = vmatpush.bf16.msra.mxu1 %v2130_v8  ;;  %v2110_v7 = vor.u32 %v2510_v6, %v2107_v40  ;;  %v2193_v8 = vld [vmem:[#allocation7 + $0x340] sm:$0xf] }
  0x9a   : > { %v2161_v40 = vld [vmem:[#allocation7 + $0x300] sm:$0xf] }
  0x9b   : > { %933 = vmatpush.bf16.msra.mxu0 %v2060_v49  ;;  %v2209_v49 = vld [vmem:[#allocation7 + $0x360] sm:$0xf] }
  0x9c   : > { %1099 = vmatpush.bf16.msra.mxu2 %v2134_v9  ;;  %v2210_v0 = vor.u32 %v2489_v50, %v2209_v49  ;;  %v2485_v9 = vld [vmem:[#allocation7 + $0x344] sm:$0xf0]  ;;  %v2241_v50 = vld [vmem:[#allocation7 + $0x3a0] sm:$0xf] }
  0x9d   : > { %1087 = vmatpush.bf16.msra.mxu1 %v2122_v25  ;;  %v2194_v13 = vor.u32 %v2485_v9, %v2193_v8  ;;  %v2506_v25 = vld [vmem:[#allocation7 + $0x3f4] sm:$0xf]  ;;  %v2225_v8 = vld [vmem:[#allocation7 + $0x380] sm:$0xf] }
  0x9e   : > { %1270 = vmatpush.bf16.msra.mxu3 %v2210_v0  ;;  %v2242_v0 = vor.u32 %v2497_v51, %v2241_v50  ;;  %v2628_v50 = vld [vmem:[#allocation9 + $0x1] ss:$0 sm:$0xff] }
  0x9f   : > { %1282 = vmatpush.bf16.msrb.mxu0 %v2282_v24  ;;  %v2219_v24 = vld [vmem:[#allocation7 + $0x378] sm:$0xf0] }
  0xa0   : > { %1100 = vmatpush.bf16.msra.mxu2 %v2126_v28  ;;  %v2286_v28 = vor.u32 %v2506_v25, %v2283_v26  ;;  %v2478_v25 = vld [vmem:[#allocation7 + $0x314] sm:$0xf]  ;;  %v2171_v26 = vld [vmem:[#allocation7 + $0x318] sm:$0xf0] }
  0xa1   : > { %1088 = vmatpush.bf16.msra.mxu1 %v2114_v56  ;;  %v2267_v56 = vld [vmem:[#allocation7 + $0x3d8] sm:$0xf0] }
  0xa2   : > { %1271 = vmatpush.bf16.msra.mxu3 %v2202_v63  ;;  %v2270_v57 = vor.u32 %v2502_v54, %v2267_v56  ;;  %v2325_v54 = vld [vmem:[#allocation7 + $0x5e0] sm:$0xf] }
  0xa3   : > { %1283 = vmatpush.bf16.msrb.mxu0 %v2274_v55  ;;  %v2206_v55 = vor.u32 %v2486_v52, %v2203_v53  ;;  %v2357_v56 = vld [vmem:[#allocation7 + $0x4e0] sm:$0xf] }
  0xa4   : > { %1101 = vmatpush.bf16.msra.mxu2 %v2118_v41  ;;  %v2479_v41 = vld [vmem:[#allocation7 + $0x314] sm:$0xf0] }
  0xa5   : > { %1089 = vmatpush.bf16.msra.mxu1 %v2106_v5  ;;  %v2170_v61 = vor.u32 %v2479_v41, %v2169_v58  ;;  %v2259_v5 = vld [vmem:[#allocation7 + $0x3c8] sm:$0xf0]  ;;  %v2530_v41 = vld [vmem:[#allocation7 + $0x4e4] sm:$0xf0] }
  0xa6   : > { %1272 = vmatpush.bf16.msra.mxu3 %v2194_v13  ;;  %v2262_v6 = vor.u32 %v2500_v3, %v2259_v5  ;;  %v2226_v13 = vor.u32 %v2493_v12, %v2225_v8  ;;  %v2353_v3 = vld [vmem:[#allocation7 + $0x4d0] sm:$0xf] }
  0xa8   : > { %1102 = vmatpush.bf16.msra.mxu2 %v2110_v7  ;;  %v2477_v7 = vld [vmem:[#allocation7 + $0x304] sm:$0xf0] }
  0xa9   : > { %v2162_v9 = vor.u32 %v2477_v7, %v2161_v40 }
  0xdb   : > { %v463_v1 = vpop.f32.mrf.mxu0 }
  0xe2   : > { %v649_v15 = vpop.f32.mrf.mxu2 }
  0xe3   : > { %v662_v16 = vpop.f32.mrf.mxu3  ;;  %v650_v21 = vadd.f32 %v649_v15, %v463_v1  ;;  %v465_v23 = vpop.f32.mrf.mxu0  ;;  %v2503_v1 = vld [vmem:[#allocation7 + $0x3d4] sm:$0xf0]  ;;  %v2097_v15 = vld [vmem:[#allocation7 + $0x400] sm:$0xf] }
  0xe4   : > { %v2266_v4 = vor.u32 %v2503_v1, %v2265_v62  ;;  %v2495_v62 = vld [vmem:[#allocation7 + $0x394] sm:$0xf0]  ;;  %v2484_v1 = vld [vmem:[#allocation7 + $0x344] sm:$0xf] }
  0xe5   : > { %v663_v29 = vadd.f32 %v662_v16, %v650_v21  ;;  %v2509_v16 = vld [vmem:[#allocation7 + $0x404] sm:$0xf0]  ;;  %v2099_v21 = vld [vmem:[#allocation7 + $0x408] sm:$0xf0]  ;;  %v2234_v63 = vor.u32 %v2495_v62, %v2233_v60 }
  0xe6   : > { %1284 = vmatpush.bf16.msrb.mxu0 %v2266_v4  ;;  %v2098_v19 = vor.u32 %v2509_v16, %v2097_v15  ;;  %v2102_v23 = vor.u32 %v2508_v20, %v2099_v21  ;;  %v2198_v4 = vor.u32 %v2484_v1, %v2195_v2  ;;  %v2187_v15 = vld [vmem:[#allocation7 + $0x338] sm:$0xf0]  ;;  %v2498_v16 = vld [vmem:[#allocation7 + $0x3b4] sm:$0xf]  ;;  %v2480_v20 = vld [vmem:[#allocation7 + $0x324] sm:$0xf] }
  0xe7   : > { %v698_v30 = vadd.f32 %v694_v22, %v663_v29  ;;  %v2490_v22 = vld [vmem:[#allocation7 + $0x374] sm:$0xf]  ;;  %v2185_v29 = vld [vmem:[#allocation7 + $0x330] sm:$0xf]  ;;  %v2179_v21 = vld [vmem:[#allocation7 + $0x328] sm:$0xf0] }
  0xe8   : > { %1090 = vmatpush.bf16.msra.mxu1 %v2098_v19  ;;  %v2222_v27 = vor.u32 %v2490_v22, %v2219_v24  ;;  %1103 = vmatpush.bf16.msra.mxu2 %v2102_v23  ;;  %v2496_v22 = vld [vmem:[#allocation7 + $0x3a4] sm:$0xf]  ;;  %v2182_v23 = vor.u32 %v2480_v20, %v2179_v21  ;;  %v2243_v24 = vld [vmem:[#allocation7 + $0x3a8] sm:$0xf0]  ;;  %v2321_v1 = vld [vmem:[#allocation7 + $0x5d0] sm:$0xf] }
  0xe9   : > { %v700_v31 = vmax.f32 %v698_v30, 0.0  ;;  %v476_v43 = vpop.f32.mrf.mxu1  ;;  %v2483_v30 = vld [vmem:[#allocation7 + $0x334] sm:$0xf0]  ;;  %v1645_v20 = vld [vmem:[#allocation10 + $0x78] sm:$0xff] }
  0xea   : > { %v651_v32 = vpop.f32.mrf.mxu2  ;;  %1285 = vmatpush.bf16.msrb.mxu0 %v2258_v18  ;;  %v2251_v18 = vld [vmem:[#allocation7 + $0x3b8] sm:$0xf0]  ;;  %v2545_v2 = vld [vmem:[#allocation7 + $0x5d4] sm:$0xf0] }
  0xeb   : > { %v664_v33 = vpop.f32.mrf.mxu3  ;;  %v701_v34 = vrot.slane %v700_v31, 6  ;;  %v704_v35 = vrot.slane %v700_v31, 7  ;;  %v739_v36 = vpack.c.bf16 %v700_v31, %v700_v31  ;;  %v2249_v31 = vld [vmem:[#allocation7 + $0x3b0] sm:$0xf]  ;;  %v2186_v32 = vor.u32 %v2483_v30, %v2185_v29  ;;  %v2235_v29 = vld [vmem:[#allocation7 + $0x398] sm:$0xf0] }
  0xec   : > { %v2499_v33 = vld [vmem:[#allocation7 + $0x3b4] sm:$0xf0]  ;;  %1295 = vmatpush.bf16.msrb.mxu1 %v2222_v27  ;;  %v2254_v19 = vor.u32 %v2498_v16, %v2251_v18  ;;  %v2246_v27 = vor.u32 %v2496_v22, %v2243_v24  ;;  %v2174_v30 = vor.u32 %v2478_v25, %v2171_v26  ;;  %v2322_v40 = vor.u32 %v2545_v2, %v2321_v1  ;;  %v2389_v18 = vld [vmem:[#allocation7 + $0x560] sm:$0xf]  ;;  %v2369_v1 = vld [vmem:[#allocation7 + $0x510] sm:$0xf] }
  0xed   : > { %v2093_v37 = vpack.c.bf16 %v704_v35, %v704_v35  ;;  %812 = vmatmul.bf16.vlgmr.msrb.gmra.mxu2 %v739_v36  ;;  %v2090_v38 = vpack.c.bf16 %v701_v34, %v701_v34  ;;  %v2250_v34 = vor.u32 %v2499_v33, %v2249_v31  ;;  %v2488_v35 = vld [vmem:[#allocation7 + $0x364] sm:$0xf]  ;;  %v2211_v36 = vld [vmem:[#allocation7 + $0x368] sm:$0xf0]  ;;  %1273 = vmatpush.bf16.msra.mxu3 %v2186_v32  ;;  %v2537_v24 = vld [vmem:[#allocation7 + $0x554] sm:$0xf0] }
  0xee   : > { %1308 = vmatpush.bf16.msrb.mxu2 %v2286_v28  ;;  %v2494_v28 = vld [vmem:[#allocation7 + $0x394] sm:$0xf]  ;;  %v2476_v32 = vld [vmem:[#allocation7 + $0x304] sm:$0xf]  ;;  %v2163_v33 = vld [vmem:[#allocation7 + $0x308] sm:$0xf0]  ;;  %v2386_v25 = vor.u32 %v2537_v24, %v2385_v10 }
  0xef   : > { %2091 = vmatmul.msk.bf16.vlgmr.msrb.gmra.mxu3 %vm3023_vm2, %v2090_v38  ;;  %2094 = vmatmul.msk.bf16.vlgmr.msra.gmra.mxu0 %vm3034_vm3, %v2093_v37  ;;  %v2504_v37 = vld [vmem:[#allocation7 + $0x3e4] sm:$0xf]  ;;  %v2214_v38 = vor.u32 %v2488_v35, %v2211_v36  ;;  %v2238_v31 = vor.u32 %v2494_v28, %v2235_v29  ;;  %v2227_v35 = vld [vmem:[#allocation7 + $0x388] sm:$0xf0]  ;;  %v2166_v36 = vor.u32 %v2476_v32, %v2163_v33  ;;  %v2317_v26 = vld [vmem:[#allocation7 + $0x5c0] sm:$0xf] }
  0xf0   : > { %1286 = vmatpush.bf16.msrb.mxu0 %v2250_v34  ;;  %v2492_v34 = vld [vmem:[#allocation7 + $0x384] sm:$0xf]  ;;  %v2349_v29 = vld [vmem:[#allocation7 + $0x4c0] sm:$0xf]  ;;  %v2536_v33 = vld [vmem:[#allocation7 + $0x544] sm:$0xf0] }
  0xf1   : > { %v478_v44 = vpop.f32.mrf.mxu1  ;;  %1296 = vmatpush.bf16.msrb.mxu1 %v2214_v38  ;;  %v2533_v2 = vld [vmem:[#allocation7 + $0x514] sm:$0xf0] }
  0xf4   : > { %1287 = vmatpush.bf16.msrb.mxu0 %v2242_v0  ;;  %v2531_v0 = vld [vmem:[#allocation7 + $0x4f4] sm:$0xf0] }
  0xf5   : > { %1297 = vmatpush.bf16.msrb.mxu1 %v2206_v55  ;;  %v2546_v55 = vld [vmem:[#allocation7 + $0x5e4] sm:$0xf0] }
  0xf6   : > { %v2326_v58 = vor.u32 %v2546_v55, %v2325_v54  ;;  %v2373_v54 = vld [vmem:[#allocation7 + $0x520] sm:$0xf] }
  0xf8   : > { %1288 = vmatpush.bf16.msrb.mxu0 %v2234_v63  ;;  %v2358_v63 = vor.u32 %v2530_v41, %v2357_v56  ;;  %v2534_v56 = vld [vmem:[#allocation7 + $0x524] sm:$0xf0]  ;;  %v2541_v41 = vld [vmem:[#allocation7 + $0x594] sm:$0xf0] }
  0xf9   : > { %1298 = vmatpush.bf16.msrb.mxu1 %v2198_v4  ;;  %v2529_v4 = vld [vmem:[#allocation7 + $0x4d4] sm:$0xf0] }
  0xfb   : > { %v675_v46 = vpop.f32.mrf.mxu0 }
  0xfc   : > { %v3059_v47 = vadd.f32 %v675_v46, %v476_v43  ;;  %v2275_v43 = vld [vmem:[#allocation7 + $0x3e8] sm:$0xf0]  ;;  %v2177_v46 = vld [vmem:[#allocation7 + $0x320] sm:$0xf]  ;;  %1289 = vmatpush.bf16.msrb.mxu0 %v2226_v13 }
  0xfd   : > { %v2278_v44 = vor.u32 %v2504_v37, %v2275_v43  ;;  %v2230_v37 = vor.u32 %v2492_v34, %v2227_v35  ;;  %v2313_v35 = vld [vmem:[#allocation7 + $0x5b0] sm:$0xf] }
  0xff   : > { %1309 = vmatpush.bf16.msrb.mxu2 %v2278_v44  ;;  %v2329_v44 = vld [vmem:[#allocation7 + $0x5f0] sm:$0xf] }
 0x103   : > { %v677_v48 = vpop.f32.mrf.mxu0  ;;  %1310 = vmatpush.bf16.msrb.mxu2 %v2270_v57 }
 0x104   : > { %v2481_v48 = vld [vmem:[#allocation7 + $0x324] sm:$0xf0] }
 0x105   : > { %v2178_v49 = vor.u32 %v2481_v48, %v2177_v46  ;;  %v2547_v46 = vld [vmem:[#allocation7 + $0x5f4] sm:$0xf0]  ;;  %v2361_v48 = vld [vmem:[#allocation7 + $0x4f0] sm:$0xf] }
 0x106   : > { %v2330_v51 = vor.u32 %v2547_v46, %v2329_v44  ;;  %v2362_v53 = vor.u32 %v2531_v0, %v2361_v48  ;;  %v2377_v44 = vld [vmem:[#allocation7 + $0x530] sm:$0xf]  ;;  %v2535_v48 = vld [vmem:[#allocation7 + $0x534] sm:$0xf0] }
 0x107   : > { %1274 = vmatpush.bf16.msra.mxu3 %v2178_v49  ;;  %1311 = vmatpush.bf16.msrb.mxu2 %v2262_v6 }
 0x108   : > { %1543 = vmatpush.bf16.msra.mxu0 %v2362_v53  ;;  %v2526_v53 = vld [vmem:[#allocation7 + $0x4a4] sm:$0xf0] }
 0x109   : > { %v3061_v42 = vpop.f32.mrf.mxu1 }
 0x10a   : > { %v689_v60 = vadd.f32 %v3061_v42, %v3059_v47  ;;  %v2393_v47 = vld [vmem:[#allocation7 + $0x570] sm:$0xf]  ;;  %v2539_v42 = vld [vmem:[#allocation7 + $0x574] sm:$0xf0] }
 0x10b   : > { %1275 = vmatpush.bf16.msra.mxu3 %v2170_v61  ;;  %1312 = vmatpush.bf16.msrb.mxu2 %v2254_v19  ;;  %v695_v61 = vperm.slane %v3052_v11, 1  ;;  %v2538_v19 = vld [vmem:[#allocation7 + $0x564] sm:$0xf0] }
 0x10c   : > { %1544 = vmatpush.bf16.msra.mxu0 %v2358_v63 }
 0x10d   : > { %v699_v7 = vadd.f32 %v695_v61, %v689_v60  ;;  %v2337_v61 = vld [vmem:[#allocation7 + $0x490] sm:$0xf] }
 0x10f   : > { %1276 = vmatpush.bf16.msra.mxu3 %v2162_v9  ;;  %1313 = vmatpush.bf16.msrb.mxu2 %v2246_v27  ;;  %v2354_v9 = vor.u32 %v2529_v4, %v2353_v3  ;;  %v2544_v27 = vld [vmem:[#allocation7 + $0x5c4] sm:$0xf0]  ;;  %v2370_v3 = vor.u32 %v2533_v2, %v2369_v1  ;;  %v2301_v4 = vld [vmem:[#allocation7 + $0x580] sm:$0xf] }
 0x110   : > { %v2318_v28 = vor.u32 %v2544_v27, %v2317_v26 }
 0x111   : > { %v690_v17 = vpop.f32.mrf.mxu1  ;;  %1545 = vmatpush.bf16.msra.mxu0 %v2354_v9 }
 0x112   : > { %v2190_v17 = vor.u32 %v2482_v14, %v2187_v15  ;;  %v2394_v14 = vor.u32 %v2539_v42, %v2393_v47 }
 0x113   : > { %1314 = vmatpush.bf16.msrb.mxu2 %v2238_v31  ;;  %1434 = vmatpush.bf16.msrb.mxu3 %v2330_v51  ;;  %v2381_v31 = vld [vmem:[#allocation7 + $0x540] sm:$0xf]  ;;  %v2542_v51 = vld [vmem:[#allocation7 + $0x5a4] sm:$0xf0] }
 0x114   : > { %1299 = vmatpush.bf16.msrb.mxu1 %v2190_v17  ;;  %v2382_v34 = vor.u32 %v2536_v33, %v2381_v31 }
 0x117   : > { %1315 = vmatpush.bf16.msrb.mxu2 %v2230_v37  ;;  %1435 = vmatpush.bf16.msrb.mxu3 %v2326_v58  ;;  %v2305_v58 = vld [vmem:[#allocation7 + $0x590] sm:$0xf] }
 0x118   : > { %1300 = vmatpush.bf16.msrb.mxu1 %v2182_v23  ;;  %v2390_v23 = vor.u32 %v2538_v19, %v2389_v18  ;;  %v2306_v60 = vor.u32 %v2541_v41, %v2305_v58 }
 0x11b   : > { %1436 = vmatpush.bf16.msrb.mxu3 %v2322_v40  ;;  %v2333_v40 = vld [vmem:[#allocation7 + $0x480] sm:$0xf] }
 0x11c   : > { %1301 = vmatpush.bf16.msrb.mxu1 %v2174_v30  ;;  %v2528_v30 = vld [vmem:[#allocation7 + $0x4c4] sm:$0xf0] }
 0x11d   : > { %v2350_v32 = vor.u32 %v2528_v30, %v2349_v29 }
 0x11f   : > { %1437 = vmatpush.bf16.msrb.mxu3 %v2318_v28  ;;  %1546 = vmatpush.bf16.msra.mxu0 %v2350_v32 }
 0x120   : > { %1302 = vmatpush.bf16.msrb.mxu1 %v2166_v36  ;;  %v2543_v36 = vld [vmem:[#allocation7 + $0x5b4] sm:$0xf0] }
 0x121   : > { %v2314_v37 = vor.u32 %v2543_v36, %v2313_v35 }
 0x123   : > { %1438 = vmatpush.bf16.msrb.mxu3 %v2314_v37 }
 0x16c   : > { %v935_v38 = vpop.f32.mrf.mxu0 }
 0x170   : > { %v813_v43 = vpop.f32.mrf.mxu2 }
 0x172   : > { %v922_v49 = vpop.f32.mrf.mxu3 }
 0x173   : > { %v923_v52 = vadd.f32 %v922_v49, %v813_v43  ;;  %v2527_v43 = vld [vmem:[#allocation7 + $0x4b4] sm:$0xf0]  ;;  %v2378_v49 = vor.u32 %v2535_v48, %v2377_v44 }
 0x174   : > { %v937_v57 = vpop.f32.mrf.mxu0  ;;  %v1644_v48 = vld [vmem:[#allocation10 + $0x70] sm:$0xff] }
 0x175   : > { %v936_v62 = vadd.f32 %v935_v38, %v923_v52  ;;  %v2345_v38 = vld [vmem:[#allocation7 + $0x4b0] sm:$0xf]  ;;  %v2341_v52 = vld [vmem:[#allocation7 + $0x4a0] sm:$0xf]  ;;  %v2374_v57 = vor.u32 %v2534_v56, %v2373_v54  ;;  %v1577_v56 = vmul.u32 8, %v3012_v59 }
 0x176   : > { %v2346_v46 = vor.u32 %v2527_v43, %v2345_v38  ;;  %v2342_v55 = vor.u32 %v2526_v53, %v2341_v52  ;;  %v1584_v38 = vstv %s1582_s8  ;;  %v1640_v52 = vld [vmem:[#allocation10 + $0x50] sm:$0xff]  ;;  %v1639_v53 = vld [vmem:[#allocation10 + $0x48] sm:$0xff] }
 0x177   : > { %v941_v5 = vadd.f32 %v2628_v50, %v936_v62  ;;  %v2309_v50 = vld [vmem:[#allocation7 + $0x5a0] sm:$0xf]  ;;  %v2525_v62 = vld [vmem:[#allocation7 + $0x494] sm:$0xf0]  ;;  %v1585_v43 = vsel %vm1583_vm6, %v1584_v38, 1 }
 0x178   : > { %v815_v6 = vpop.f32.mrf.mxu2  ;;  %1547 = vmatpush.bf16.msra.mxu0 %v2346_v46  ;;  %v2310_v0 = vor.u32 %v2542_v51, %v2309_v50  ;;  %v2338_v63 = vor.u32 %v2525_v62, %v2337_v61  ;;  %v1588_v44 = vcvt.s32.f32 %v1585_v43  ;;  %v1642_v50 = vld [vmem:[#allocation10 + $0x60] sm:$0xff]  ;;  %v1641_v51 = vld [vmem:[#allocation10 + $0x58] sm:$0xff] }
 0x179   : > { %v942_v8 = vmax.f32 %v941_v5, 0.0  ;;  %v2540_v5 = vld [vmem:[#allocation7 + $0x584] sm:$0xf0] }
 0x17a   : > { %v924_v12 = vpop.f32.mrf.mxu3  ;;  %1439 = vmatpush.bf16.msrb.mxu3 %v2310_v0  ;;  %v2302_v6 = vor.u32 %v2540_v5, %v2301_v4  ;;  %v1589_v46 = vmax.f32 %v1588_v44, 1.0  ;;  %v2629_v5 = vld [vmem:[#allocation9 + $0x3] ss:$0 sm:$0xff] }
 0x17b   : > { %v943_v13 = vadd.f32 %v942_v8, %v699_v7  ;;  %v2524_v7 = vld [vmem:[#allocation7 + $0x484] sm:$0xf0]  ;;  %v2365_v8 = vld [vmem:[#allocation7 + $0x500] sm:$0xf] }
 0x17c   : > { %1548 = vmatpush.bf16.msra.mxu0 %v2342_v55  ;;  %v2334_v9 = vor.u32 %v2524_v7, %v2333_v40  ;;  %v2532_v12 = vld [vmem:[#allocation7 + $0x504] sm:$0xf0]  ;;  %2630 = vrcp.f32 %v1589_v46  ;;  %v1576_v55 = vand.u32 127, %v298_v45  ;;  %vm1595_vm7 = vweird.f32 %v1589_v46 }
 0x17d   : > { %v944_v11 = vmax.f32 %v943_v13, 0.0  ;;  %v2366_v13 = vor.u32 %v2532_v12, %v2365_v8  ;;  %v1601_v2 = vand.u32 2147483648, %v1589_v46  ;;  %v1634_v40 = vld [vmem:[#allocation10 + $0x20] sm:$0xff] }
 0x17e   : > { %1440 = vmatpush.bf16.msrb.mxu3 %v2306_v60  ;;  %v1637_v60 = vld [vmem:[#allocation10 + $0x38] sm:$0xff]  ;;  %v1578_v62 = vsub.s32 %v1576_v55, %v1577_v56 }
 0x17f   : > { %v945_v15 = vrot.slane %v944_v11, 4  ;;  %v951_v16 = vrot.slane %v944_v11, 6  ;;  %v986_v17 = vpack.c.bf16 %v944_v11, %v944_v11  ;;  %v1602_v12 = vor.u32 1.1754944e-38, %v1601_v2 }
 0x180   : > { %1549 = vmatpush.bf16.msra.mxu0 %v2338_v63  ;;  %v1636_v63 = vld [vmem:[#allocation10 + $0x30] sm:$0xff]  ;;  %vm1579_vm9 = vcmp.ge.s32.totalorder %v1578_v62, 0  ;;  %vm1580_vm10 = vcmp.lt.s32.totalorder %v1578_v62, 8  ;;  %vm1586_vm13 = vcmp.lt.s32.totalorder %v1578_v62, %v1585_v43 }
 0x181   : > { %1091 = vmatmul.bf16.vlgmr.msra.gmra.mxu1 %v986_v17  ;;  %1104 = vmatmul.bf16.vlgmr.msra.gmra.mxu2 %v986_v17  ;;  %v2288_v21 = vpack.c.bf16 %v945_v15, %v945_v15  ;;  %v2291_v22 = vpack.c.bf16 %v951_v16, %v951_v16  ;;  %vm1581_vm12 = vmand %vm1579_vm9, %vm1580_vm10 }
 0x182   : > { %1556 = vmatpush.bf16.msra.mxu1 %v2394_v14  ;;  %1441 = vmatpush.bf16.msrb.mxu3 %v2302_v6  ;;  %v1322_v14 = vld [vmem:[#allocation9 + $0x2] ss:$4 sm:$0x3]  ;;  %v1599_v6 = vand.u32 2147483647, %v1589_v46  ;;  %vm1587_vm15 = vmand %vm1581_vm12, %vm1586_vm13 }
 0x183   : > { %2289 = vmatmul.msk.bf16.vlgmr.msra.gmra.mxu3 %vm3067_vm5, %v2288_v21  ;;  %2292 = vmatmul.msk.bf16.vlgmr.msrb.gmra.mxu0 %vm3023_vm2, %v2291_v22  ;;  %v1324_v18 = vperm.slane %v1322_v14, 0  ;;  %v1325_v32 = vperm.slane %v1322_v14, 1 }
 0x184   : > { %1550 = vmatpush.bf16.msra.mxu0 %v2334_v9  ;;  %vm1600_vm14 = vcmp.eq.f32.partialorder %v1599_v6, 8.507059e+37 }
 0x186   : > { %1557 = vmatpush.bf16.msra.mxu1 %v2390_v23  ;;  %1647 = vmatpush.msra.mxu3 %v1645_v20 }
 0x188   : > { %1648 = vmatpush.msra.mxu3 %v1644_v48 }
 0x18a   : > { %1558 = vmatpush.bf16.msra.mxu1 %v2386_v25  ;;  %1649 = vmatpush.msra.mxu3 %v1643_v39 }
 0x18c   : > { %1650 = vmatpush.msra.mxu3 %v1642_v50 }
 0x18e   : > { %1559 = vmatpush.bf16.msra.mxu1 %v2382_v34  ;;  %1651 = vmatpush.msra.mxu3 %v1641_v51 }
 0x190   : > { %1652 = vmatpush.msra.mxu3 %v1640_v52 }
 0x191   : > { %2295 = vmatmul.msk.bf16.vlgmr.msrb.gmra.mxu1 %vm3067_vm5, %v2288_v21  ;;  %2298 = vmatmul.msk.bf16.vlgmr.msrb.gmra.mxu2 %vm3023_vm2, %v2291_v22 }
 0x192   : > { %1560 = vmatpush.bf16.msra.mxu1 %v2378_v49  ;;  %v2631_v49 = vpop.eup %2630  ;;  %1653 = vmatpush.msra.mxu3 %v1639_v53 }
 0x193   : > { %v1591_v0 = vmul.f32 %v2631_v49, %v1589_v46  ;;  %vm1596_vm8 = vweird.f32 %v2631_v49 }
 0x194   : > { %vm3089_vm11 = vmor %vm1595_vm7, %vm1596_vm8 }
 0x195   : > { %v1592_v54 = vsub.f32 1.0, %v1591_v0 }
 0x196   : > { %1561 = vmatpush.bf16.msra.mxu1 %v2374_v57  ;;  %v1638_v57 = vld [vmem:[#allocation10 + $0x40] sm:$0xff] }
 0x197   : > { %v1593_v61 = vmul.f32 %v2631_v49, %v1592_v54  ;;  %1654 = vmatpush.msra.mxu3 %v1638_v57 }
 0x199   : > { %1655 = vmatpush.msra.mxu3 %v1637_v60  ;;  %v1594_v45 = vadd.f32 %v2631_v49, %v1593_v61 }
 0x19a   : > { %1562 = vmatpush.bf16.msra.mxu1 %v2370_v3  ;;  %v1635_v3 = vld [vmem:[#allocation10 + $0x28] sm:$0xff] }
 0x19b   : > { %1656 = vmatpush.msra.mxu3 %v1636_v63 }
 0x19d   : > { %1657 = vmatpush.msra.mxu3 %v1635_v3 }
 0x19e   : > { %1563 = vmatpush.bf16.msra.mxu1 %v2366_v13  ;;  %v1633_v13 = vld [vmem:[#allocation10 + $0x18] sm:$0xff] }
 0x19f   : > { %1658 = vmatpush.msra.mxu3 %v1634_v40 }
 0x1a1   : > { %1659 = vmatpush.msra.mxu3 %v1633_v13 }
 0x1fe   : > { %v1092_v47 = vpop.f32.mrf.mxu1 }
 0x200   : > { %v1291_v42 = vpop.f32.mrf.mxu0 }
 0x204   : > { %v1105_v11 = vpop.f32.mrf.mxu2 }
 0x206   : > { %v1094_v15 = vpop.f32.mrf.mxu1  ;;  %v1278_v16 = vpop.f32.mrf.mxu3 }
 0x207   : > { %v1279_v17 = vadd.f32 %v1278_v16, %v1092_v47 }
 0x208   : > { %v1293_v19 = vpop.f32.mrf.mxu0 }
 0x209   : > { %v1292_v21 = vadd.f32 %v1291_v42, %v1279_v17  ;;  %v1598_v42 = vsel %vm3089_vm11, %v2631_v49, %v1594_v45  ;;  %v1631_v17 = vld [vmem:[#allocation10 + $0x8] sm:$0xff] }
 0x20a   : > { %v1603_v16 = vsel %vm1600_vm14, %v1602_v12, %v1598_v42 }
 0x20b   : > { %v1328_v22 = vadd.f32 %v1324_v18, %v1292_v21  ;;  %v1605_v21 = vsel %vm1587_vm15, %v1603_v16, 0.0 }
 0x20c   : > { %v1107_v23 = vpop.f32.mrf.mxu2 }
 0x20d   : > { %v1330_v10 = vmax.f32 %v1328_v22, 0.0  ;;  %v1630_v22 = vld [vmem:[#allocation10] sm:$0xff] }
 0x20e   : > { %v1280_v24 = vpop.f32.mrf.mxu3  ;;  %v1304_v25 = vpop.f32.mrf.mxu1 }
 0x20f   : > { %v1331_v26 = vrot.slane %v1330_v10, 4  ;;  %v1334_v27 = vrot.slane %v1330_v10, 6  ;;  %v1305_v28 = vadd.f32 %v1304_v25, %v1105_v11  ;;  %v1369_v29 = vpack.c.bf16 %v1330_v10, %v1330_v10  ;;  %v1632_v11 = vld [vmem:[#allocation10 + $0x10] sm:$0xff] }
 0x210   : > { %1660 = vmatpush.msra.mxu3 %v1632_v11  ;;  %v1646_v10 = vld [vmem:[%s3138_s5] sm:$0x1] }
 0x211   : > { %v2396_v30 = vpack.c.bf16 %v1331_v26, %v1331_v26  ;;  %v2399_v31 = vpack.c.bf16 %v1334_v27, %v1334_v27  ;;  %1442 = vmatmul.bf16.vlgmr.msrb.gmra.mxu3 %v1369_v29 }
 0x212   : > { %1661 = vmatpush.msra.mxu3 %v1631_v17 }
 0x213   : > { %2397 = vmatmul.msk.bf16.vlgmr.msra.gmra.mxu0 %vm3067_vm5, %v2396_v30  ;;  %2400 = vmatmul.msk.bf16.vlgmr.msra.gmra.mxu1 %vm3023_vm2, %v2399_v31 }
 0x214   : > { %v1317_v33 = vpop.f32.mrf.mxu2  ;;  %1662 = vmatpush.msra.mxu3 %v1630_v22 }
 0x215   : > { %v1318_v34 = vadd.f32 %v1317_v33, %v1305_v28 }
 0x216   : > { %v1306_v35 = vpop.f32.mrf.mxu1 }
 0x217   : > { %v3083_v36 = vadd.f32 %v1325_v32, %v1318_v34 }
 0x21c   : > { %v1319_v37 = vpop.f32.mrf.mxu2 }
 0x290   : > { %v1552_v58 = vpop.f32.mrf.mxu0  ;;  %v1565_v41 = vpop.f32.mrf.mxu1 }
 0x294   : > { %v1443_v1 = vpop.f32.mrf.mxu3 }
 0x295   : > { %v1553_v4 = vadd.f32 %v1552_v58, %v1443_v1 }
 0x297   : > { %v1566_v7 = vadd.f32 %v1565_v41, %v1553_v4 }
 0x298   : > { %v1554_v8 = vpop.f32.mrf.mxu0  ;;  %v1567_v9 = vpop.f32.mrf.mxu1 }
 0x299   : > { %v1571_v47 = vadd.f32 %v2629_v5, %v1566_v7 }
 0x29b   : > { %v1572_v14 = vmax.f32 %v1571_v47, 0.0 }
 0x29c   : > { %v1445_v15 = vpop.f32.mrf.mxu3 }
 0x29d   : > { %v1573_v18 = vadd.f32 %v1572_v14, %v3083_v36 }
 0x29f   : > { %v1574_v19 = vmax.f32 %v1573_v18, 0.0 }
 0x2a1   : > { %1625 = vmatpush.msra.mxu2 %v1574_v19 }
 0x2a2   : > { %2401 = vmatmul.msk.f32.vlgmr.msra.gmra.mxu2 %vm1606_vm0, %v1605_v21 }
 0x325   : > { %v1627_v23 = vpop.f32.mrf.mxu2 }
 0x326   : > { %1663 = vmatmul.f32.vlgmr.msra.gmra.mxu3 %v1627_v23 }
 0x3a9   : > { %v1664_v24 = vpop.f32.mrf.mxu3 }
 0x3aa   : > { %v1665_v25 = vadd.f32 %v1664_v24, %v1646_v10 }
 0x3ac   : > { %1667 = vst [vmem:[%s297_s24] sm:$0x1] %v1665_v25 }
 0x3ad   : > { %2791 = shalt.err (!%p2788_p9)
}
 0x3ae   : > { %2562 = dma.vmem_to_hbm [thread:$0]  (%p2962_p13), %s1680_s29, 16, %s1682_s15, %s1669_s14  }
 0x3af PF: > { %s1693_s12 = sand.u32 1, %s2828_s25   ;;  %p3154_p10 = scmp.ge.s32.totalorder %s2840_s28, 2 }
 0x3b0   : > { %s1694_s10 = scalar_lea.sflag [#allocation6], %s1693_s12 }
 0x3b1   : > { %p2579_p11 = pnand %p3154_p10, %p2967_p4 }
 0x3b3   : > { %p2580_p0 = pneg %p2579_p11 }
 0x3b5   : > { %2823 = dma.done.wait (%p2580_p0), %s1694_s10, 16  }
 0x3b6   : > { %2825 = vsyncadd (%p2580_p0), %s1694_s10, 4294967280  ;;  %p29_p2 = scmp.ge.s32.totalorder %s2942_s0, 4   ;;  %s3155_s25 = smov %s2832_s26 }
 0x3b7   : > { %s3156_s26 = smov %s2836_s27  ;;  %s3157_s27 = smov %s2954_s9 }
 0x3b8   : > { %s3158_s28 = smov %s2942_s0  ;;  %31 = sbr.rel (!%p29_p2) target bundleno = 13 (0xd), region = 98 }
 0x3bd   :  { %1699 = vsyncpa [#allocation5], 1 }
 0x3be   :  { %1701 = vsyncpa [#allocation5 + $0x1], 1 }
 0x3bf   :  { %1702 = vsyncpa [#allocation8], 1 }
 0x3c0   :  { %1703 = vsyncpa [#allocation11], 1 }
 0x3c1   :  { %1704 = vsyncpa [#allocation6], 1 }
 0x3c2   :  { %1706 = vsyncpa [#allocation6 + $0x1], 1 }

</bundles_post_ra>
